<compile_context>
chip_gen: v7x
topology: tpu7x:2x2x1
jax: 0.10.0
libtpu: 0.0.40
codegen_flags: <defaults>
</compile_context>

<pallas_src>
import math

import jax
import jax.numpy as jnp
from jax.experimental import pallas as pl
from jax.experimental.pallas import tpu as pltpu


def _round_up(x, m):
    return (x + m - 1) // m * m


def _tpu_vmem_capacity_bytes():
    try:
        info = pltpu.get_tpu_info()
        cap = int(getattr(info, "vmem_capacity_bytes", 0))
        if cap > 0:
            return cap
    except Exception:
        pass
    return 64 * 1024 * 1024  # conservative default = v7x per-TensorCore VMEM


def _level_geometry(H, W, levels):
    """Static (kernel-size, centered-pad) geometry for each pyramid level."""
    geoms = []
    for L in levels:
        hk = int(math.ceil(H / L))
        wk = int(math.ceil(W / L))
        hp1 = (hk * L - H) // 2
        wp1 = (wk * L - W) // 2
        geoms.append((L, hk, wk, hp1, wp1))
    return geoms


def _make_spp_kernel(levels, mode, H, W):
    geoms = _level_geometry(H, W, levels)

    def kernel(x_ref, o_ref):
        # x_ref: (tb, tc, H, W)  -- native NCHW block; W lane-dense, H on sublanes.
        # o_ref: (tb, total_bins, tc) -- pooled values, channels lane-dense.
        tb, tc = x_ref.shape[0], x_ref.shape[1]
        red_dtype = x_ref.dtype if mode == "max" else jnp.float32
        results = []
        for (L, hk, wk, hp1, wp1) in geoms:
            inv_k = 1.0 / float(hk * wk)
            for i in range(L):
                r0, r1 = i * hk - hp1, (i + 1) * hk - hp1
                rr0, rr1 = max(0, r0), min(H, r1)
                row_valid = rr1 > rr0
                if row_valid:
                    # Reduce H (sublanes) once per bin-row, shared by all bin cols.
                    band = x_ref[:, :, rr0:rr1, :]             # (tb, tc, hwin, W)
                    if mode == "max":
                        band_red = jnp.max(band, axis=2)       # (tb, tc, W)
                    else:
                        band_red = jnp.sum(band, axis=2, dtype=jnp.float32)
                for j in range(L):
                    c0, c1 = j * wk - wp1, (j + 1) * wk - wp1
                    cc0, cc1 = max(0, c0), min(W, c1)
                    col_valid = cc1 > cc0
                    has_pad = (r0 < 0) or (r1 > H) or (c0 < 0) or (c1 > W)
                    if not (row_valid and col_valid):
                        # Bin lies entirely inside the zero padding.
                        results.append(jnp.zeros((tb, tc), red_dtype))
                        continue
                    win = band_red[:, :, cc0:cc1]              # (tb, tc, wwin)
                    if mode == "max":
                        r = jnp.max(win, axis=2)               # (tb, tc)
                        if has_pad:
                            # Padded zeros participate in the max (F.pad + MaxPool2d).
                            r = jnp.maximum(r, 0)
                    else:
                        # Zeros count toward the full hk*wk denominator
                        # (AvgPool2d default count_include_pad=True).
                        r = jnp.sum(win, axis=2) * inv_k
                    results.append(r)
        # One batched store for the whole output block (no per-bin masked stores).
        stacked = jnp.stack(results, axis=1)                   # (tb, total_bins, tc)
        o_ref[...] = stacked.astype(o_ref.dtype)

    return kernel


def spatial_pyramid_pool(x, levels, mode="max", *,
                         vmem_block_bytes=8 * 1024 * 1024):
    """x: (B, C, H, W) -> (B, sum(C * level**2)); matches PyTorch PyramidPooling."""
    if mode not in ("max", "avg"):
        raise ValueError('Unknown pooling type: %s, please use "max" or "avg".' % mode)
    B, C, H, W = x.shape
    levels = tuple(int(l) for l in levels)
    total_bins = sum(L * L for L in levels)
    itemsize = jnp.dtype(x.dtype).itemsize

    # ---- Tile selection against VMEM (no wrapper-side relayout of x). ----
    Hp, Wp = _round_up(H, 8), _round_up(W, 128)
    plane_bytes = Hp * Wp * itemsize                   # VMEM-padded (H, W) plane
    cap = _tpu_vmem_capacity_bytes()
    budget = min(int(vmem_block_bytes), cap // 6)      # leave room for 2x buffers + out
    budget = max(budget, plane_bytes)
    max_planes = max(1, budget // plane_bytes)

    # Channel tile: output block's last dim must be a multiple of 128 or full C.
    if C <= 128:
        tc = C
    else:
        tc = 128 * max(1, min(max_planes, C) // 128)
        # TODO(synk): add spatial (H) tiling (split at bin-row boundaries) for
        # feature maps so large that even a 128-channel block exceeds the budget.
    tb = min(B, max(1, max_planes // tc))

    grid_b, grid_c = pl.cdiv(B, tb), pl.cdiv(C, tc)
    # v7x has 2 TensorCores per chip: make sure there are >= 2 parallel grid steps.
    if grid_b * grid_c == 1:
        if B >= 2:
            tb = pl.cdiv(B, 2)
            grid_b = pl.cdiv(B, tb)
        elif C > 128 and tc >= 256:
            tc = 128 * pl.cdiv(tc // 128, 2)
            grid_c = pl.cdiv(C, tc)

    # VMEM footprint: double-buffered input + double-buffered output + headroom.
    in_bytes = tb * tc * plane_bytes
    out_bytes = tb * _round_up(total_bins, 8) * _round_up(tc, 128) * itemsize
    vmem_limit = min(cap, max(2 * in_bytes + 2 * out_bytes + (4 << 20), 16 << 20))

    kernel = _make_spp_kernel(levels, mode, H, W)

    out = pl.pallas_call(
        kernel,
        out_shape=jax.ShapeDtypeStruct((B, total_bins, C), x.dtype),
        grid_spec=pltpu.PrefetchScalarGridSpec(
            num_scalar_prefetch=0,
            grid=(grid_b, grid_c),
            in_specs=[pl.BlockSpec((tb, tc, H, W), lambda b, c: (b, c, 0, 0))],
            out_specs=pl.BlockSpec((tb, total_bins, tc), lambda b, c: (b, 0, c)),
        ),
        compiler_params=pltpu.CompilerParams(
            dimension_semantics=("parallel", "parallel"),
            vmem_limit_bytes=int(vmem_limit),
        ),
    )(x)

    # Back to the PyTorch flatten order: per level (B, C, L, L) -> (B, C*L*L).
    # Post-processing acts on the tiny (B, total_bins, C) pooled output only.
    pieces = []
    off = 0
    for L in levels:
        o = out[:, off:off + L * L, :]                 # (B, L*L, C)
        pieces.append(jnp.transpose(o, (0, 2, 1)).reshape(B, C * L * L))
        off += L * L
    return jnp.concatenate(pieces, axis=1)


class PyramidPooling:
    """JAX/Pallas port of the PyTorch PyramidPooling module (spatial variant)."""

    def __init__(self, levels, mode="max"):
        self.levels = levels
        self.mode = mode

    def __call__(self, x):
        return spatial_pyramid_pool(x, self.levels, self.mode)

    def get_output_size(self, filters):
        return sum(filters * l * l for l in self.levels)


def _spp_reference(x, levels, mode):
    """Pure-JAX replica of the PyTorch module for validation."""
    B, C, H, W = x.shape
    outs = []
    for L in levels:
        hk = int(math.ceil(H / L))
        wk = int(math.ceil(W / L))
        hp1 = (hk * L - H) // 2
        hp2 = hk * L - H - hp1
        wp1 = (wk * L - W) // 2
        wp2 = wk * L - W - wp1
        xp = jnp.pad(x, ((0, 0), (0, 0), (hp1, hp2), (wp1, wp2)))
        xr = xp.reshape(B, C, L, hk, L, wk)
        if mode == "max":
            pooled = jnp.max(xr, axis=(3, 5))
        else:
            pooled = jnp.mean(xr, axis=(3, 5))
        outs.append(pooled.reshape(B, -1))
    return jnp.concatenate(outs, axis=1)


if __name__ == "__main__":
    key = jax.random.PRNGKey(0)
    B, C, H, W = 2, 4, 16, 16
    levels = [1, 2, 3, 6]          # exercises the centered-zero-padding path
    x = jax.random.normal(key, (B, C, H, W), dtype=jnp.float32)

    for mode in ("max", "avg"):
        out = jax.block_until_ready(spatial_pyramid_pool(x, levels, mode))
        ref = _spp_reference(x, levels, mode)
        expected_cols = sum(C * L * L for L in levels)
        assert out.shape == (B, expected_cols), out.shape
        assert jnp.allclose(out, ref, atol=1e-5, rtol=1e-5), (
            f"mismatch for mode={mode}: max abs err "
            f"{jnp.max(jnp.abs(out - ref))}")

    print("KERNEL_OK")
</pallas_src>

<mosaic_0001>
module attributes {stable_mosaic.version = 11 : i64} {
  func.func @kernel(%arg0: i32, %arg1: i32, %arg2: memref<1x4x16x16xf32, #tpu.memory_space<vmem>>, %arg3: memref<1x50x4xf32, #tpu.memory_space<vmem>>) attributes {dimension_semantics = [#tpu.dimension_semantics<parallel>, #tpu.dimension_semantics<parallel>], iteration_bounds = array<i64: 2, 1>, scalar_prefetch = 0 : i64, scratch_operands = 0 : i64, tpu.core_type = #tpu.core_type<tc>, window_params = [{transform_indices = @transform_0, window_bounds = array<i64: 1, 4, 16, 16>}, {transform_indices = @transform_1, window_bounds = array<i64: 1, 50, 4>}]} {
    %c0 = arith.constant 0 : index
    %c0_0 = arith.constant 0 : index
    %c0_1 = arith.constant 0 : index
    %c0_2 = arith.constant 0 : index
    %0 = vector.load %arg2[%c0, %c0_0, %c0_1, %c0_2] : memref<1x4x16x16xf32, #tpu.memory_space<vmem>>, vector<1x4x16x16xf32>
    %cst = arith.constant dense<0xFF800000> : vector<1x4x16xf32>
    %1 = vector.multi_reduction <maximumf>, %0, %cst [2] : vector<1x4x16x16xf32> to vector<1x4x16xf32>
    %cst_3 = arith.constant dense<0xFF800000> : vector<1x4xf32>
    %2 = vector.multi_reduction <maximumf>, %1, %cst_3 [2] : vector<1x4x16xf32> to vector<1x4xf32>
    %c0_4 = arith.constant 0 : index
    %c0_5 = arith.constant 0 : index
    %c0_6 = arith.constant 0 : index
    %c0_7 = arith.constant 0 : index
    %3 = vector.load %arg2[%c0_4, %c0_5, %c0_6, %c0_7] : memref<1x4x16x16xf32, #tpu.memory_space<vmem>>, vector<1x4x8x16xf32>
    %cst_8 = arith.constant dense<0xFF800000> : vector<1x4x16xf32>
    %4 = vector.multi_reduction <maximumf>, %3, %cst_8 [2] : vector<1x4x8x16xf32> to vector<1x4x16xf32>
    %5 = vector.extract_strided_slice %4 {offsets = [0, 0, 0], sizes = [1, 4, 8], strides = [1, 1, 1]} : vector<1x4x16xf32> to vector<1x4x8xf32>
    %cst_9 = arith.constant dense<0xFF800000> : vector<1x4xf32>
    %6 = vector.multi_reduction <maximumf>, %5, %cst_9 [2] : vector<1x4x8xf32> to vector<1x4xf32>
    %7 = vector.extract_strided_slice %4 {offsets = [0, 0, 8], sizes = [1, 4, 8], strides = [1, 1, 1]} : vector<1x4x16xf32> to vector<1x4x8xf32>
    %cst_10 = arith.constant dense<0xFF800000> : vector<1x4xf32>
    %8 = vector.multi_reduction <maximumf>, %7, %cst_10 [2] : vector<1x4x8xf32> to vector<1x4xf32>
    %c0_11 = arith.constant 0 : index
    %c0_12 = arith.constant 0 : index
    %c8 = arith.constant 8 : index
    %c0_13 = arith.constant 0 : index
    %9 = vector.load %arg2[%c0_11, %c0_12, %c8, %c0_13] : memref<1x4x16x16xf32, #tpu.memory_space<vmem>>, vector<1x4x8x16xf32>
    %cst_14 = arith.constant dense<0xFF800000> : vector<1x4x16xf32>
    %10 = vector.multi_reduction <maximumf>, %9, %cst_14 [2] : vector<1x4x8x16xf32> to vector<1x4x16xf32>
    %11 = vector.extract_strided_slice %10 {offsets = [0, 0, 0], sizes = [1, 4, 8], strides = [1, 1, 1]} : vector<1x4x16xf32> to vector<1x4x8xf32>
    %cst_15 = arith.constant dense<0xFF800000> : vector<1x4xf32>
    %12 = vector.multi_reduction <maximumf>, %11, %cst_15 [2] : vector<1x4x8xf32> to vector<1x4xf32>
    %13 = vector.extract_strided_slice %10 {offsets = [0, 0, 8], sizes = [1, 4, 8], strides = [1, 1, 1]} : vector<1x4x16xf32> to vector<1x4x8xf32>
    %cst_16 = arith.constant dense<0xFF800000> : vector<1x4xf32>
    %14 = vector.multi_reduction <maximumf>, %13, %cst_16 [2] : vector<1x4x8xf32> to vector<1x4xf32>
    %c0_17 = arith.constant 0 : index
    %c0_18 = arith.constant 0 : index
    %c0_19 = arith.constant 0 : index
    %c0_20 = arith.constant 0 : index
    %15 = vector.load %arg2[%c0_17, %c0_18, %c0_19, %c0_20] : memref<1x4x16x16xf32, #tpu.memory_space<vmem>>, vector<1x4x5x16xf32>
    %cst_21 = arith.constant dense<0xFF800000> : vector<1x4x16xf32>
    %16 = vector.multi_reduction <maximumf>, %15, %cst_21 [2] : vector<1x4x5x16xf32> to vector<1x4x16xf32>
    %17 = vector.extract_strided_slice %16 {offsets = [0, 0, 0], sizes = [1, 4, 5], strides = [1, 1, 1]} : vector<1x4x16xf32> to vector<1x4x5xf32>
    %cst_22 = arith.constant dense<0xFF800000> : vector<1x4xf32>
    %18 = vector.multi_reduction <maximumf>, %17, %cst_22 [2] : vector<1x4x5xf32> to vector<1x4xf32>
    %cst_23 = arith.constant 0.000000e+00 : f32
    %19 = vector.broadcast %cst_23 : f32 to vector<1x4xf32>
    %20 = arith.maximumf %18, %19 : vector<1x4xf32>
    %21 = vector.extract_strided_slice %16 {offsets = [0, 0, 5], sizes = [1, 4, 6], strides = [1, 1, 1]} : vector<1x4x16xf32> to vector<1x4x6xf32>
    %cst_24 = arith.constant dense<0xFF800000> : vector<1x4xf32>
    %22 = vector.multi_reduction <maximumf>, %21, %cst_24 [2] : vector<1x4x6xf32> to vector<1x4xf32>
    %cst_25 = arith.constant 0.000000e+00 : f32
    %23 = vector.broadcast %cst_25 : f32 to vector<1x4xf32>
    %24 = arith.maximumf %22, %23 : vector<1x4xf32>
    %25 = vector.extract_strided_slice %16 {offsets = [0, 0, 11], sizes = [1, 4, 5], strides = [1, 1, 1]} : vector<1x4x16xf32> to vector<1x4x5xf32>
    %cst_26 = arith.constant dense<0xFF800000> : vector<1x4xf32>
    %26 = vector.multi_reduction <maximumf>, %25, %cst_26 [2] : vector<1x4x5xf32> to vector<1x4xf32>
    %cst_27 = arith.constant 0.000000e+00 : f32
    %27 = vector.broadcast %cst_27 : f32 to vector<1x4xf32>
    %28 = arith.maximumf %26, %27 : vector<1x4xf32>
    %c0_28 = arith.constant 0 : index
    %c0_29 = arith.constant 0 : index
    %c5 = arith.constant 5 : index
    %c0_30 = arith.constant 0 : index
    %29 = vector.load %arg2[%c0_28, %c0_29, %c5, %c0_30] : memref<1x4x16x16xf32, #tpu.memory_space<vmem>>, vector<1x4x6x16xf32>
    %cst_31 = arith.constant dense<0xFF800000> : vector<1x4x16xf32>
    %30 = vector.multi_reduction <maximumf>, %29, %cst_31 [2] : vector<1x4x6x16xf32> to vector<1x4x16xf32>
    %31 = vector.extract_strided_slice %30 {offsets = [0, 0, 0], sizes = [1, 4, 5], strides = [1, 1, 1]} : vector<1x4x16xf32> to vector<1x4x5xf32>
    %cst_32 = arith.constant dense<0xFF800000> : vector<1x4xf32>
    %32 = vector.multi_reduction <maximumf>, %31, %cst_32 [2] : vector<1x4x5xf32> to vector<1x4xf32>
    %cst_33 = arith.constant 0.000000e+00 : f32
    %33 = vector.broadcast %cst_33 : f32 to vector<1x4xf32>
    %34 = arith.maximumf %32, %33 : vector<1x4xf32>
    %35 = vector.extract_strided_slice %30 {offsets = [0, 0, 5], sizes = [1, 4, 6], strides = [1, 1, 1]} : vector<1x4x16xf32> to vector<1x4x6xf32>
    %cst_34 = arith.constant dense<0xFF800000> : vector<1x4xf32>
    %36 = vector.multi_reduction <maximumf>, %35, %cst_34 [2] : vector<1x4x6xf32> to vector<1x4xf32>
    %37 = vector.extract_strided_slice %30 {offsets = [0, 0, 11], sizes = [1, 4, 5], strides = [1, 1, 1]} : vector<1x4x16xf32> to vector<1x4x5xf32>
    %cst_35 = arith.constant dense<0xFF800000> : vector<1x4xf32>
    %38 = vector.multi_reduction <maximumf>, %37, %cst_35 [2] : vector<1x4x5xf32> to vector<1x4xf32>
    %cst_36 = arith.constant 0.000000e+00 : f32
    %39 = vector.broadcast %cst_36 : f32 to vector<1x4xf32>
    %40 = arith.maximumf %38, %39 : vector<1x4xf32>
    %c0_37 = arith.constant 0 : index
    %c0_38 = arith.constant 0 : index
    %c11 = arith.constant 11 : index
    %c0_39 = arith.constant 0 : index
    %41 = vector.load %arg2[%c0_37, %c0_38, %c11, %c0_39] : memref<1x4x16x16xf32, #tpu.memory_space<vmem>>, vector<1x4x5x16xf32>
    %cst_40 = arith.constant dense<0xFF800000> : vector<1x4x16xf32>
    %42 = vector.multi_reduction <maximumf>, %41, %cst_40 [2] : vector<1x4x5x16xf32> to vector<1x4x16xf32>
    %43 = vector.extract_strided_slice %42 {offsets = [0, 0, 0], sizes = [1, 4, 5], strides = [1, 1, 1]} : vector<1x4x16xf32> to vector<1x4x5xf32>
    %cst_41 = arith.constant dense<0xFF800000> : vector<1x4xf32>
    %44 = vector.multi_reduction <maximumf>, %43, %cst_41 [2] : vector<1x4x5xf32> to vector<1x4xf32>
    %cst_42 = arith.constant 0.000000e+00 : f32
    %45 = vector.broadcast %cst_42 : f32 to vector<1x4xf32>
    %46 = arith.maximumf %44, %45 : vector<1x4xf32>
    %47 = vector.extract_strided_slice %42 {offsets = [0, 0, 5], sizes = [1, 4, 6], strides = [1, 1, 1]} : vector<1x4x16xf32> to vector<1x4x6xf32>
    %cst_43 = arith.constant dense<0xFF800000> : vector<1x4xf32>
    %48 = vector.multi_reduction <maximumf>, %47, %cst_43 [2] : vector<1x4x6xf32> to vector<1x4xf32>
    %cst_44 = arith.constant 0.000000e+00 : f32
    %49 = vector.broadcast %cst_44 : f32 to vector<1x4xf32>
    %50 = arith.maximumf %48, %49 : vector<1x4xf32>
    %51 = vector.extract_strided_slice %42 {offsets = [0, 0, 11], sizes = [1, 4, 5], strides = [1, 1, 1]} : vector<1x4x16xf32> to vector<1x4x5xf32>
    %cst_45 = arith.constant dense<0xFF800000> : vector<1x4xf32>
    %52 = vector.multi_reduction <maximumf>, %51, %cst_45 [2] : vector<1x4x5xf32> to vector<1x4xf32>
    %cst_46 = arith.constant 0.000000e+00 : f32
    %53 = vector.broadcast %cst_46 : f32 to vector<1x4xf32>
    %54 = arith.maximumf %52, %53 : vector<1x4xf32>
    %c0_47 = arith.constant 0 : index
    %c0_48 = arith.constant 0 : index
    %c0_49 = arith.constant 0 : index
    %c0_50 = arith.constant 0 : index
    %55 = vector.load %arg2[%c0_47, %c0_48, %c0_49, %c0_50] : memref<1x4x16x16xf32, #tpu.memory_space<vmem>>, vector<1x4x2x16xf32>
    %cst_51 = arith.constant dense<0xFF800000> : vector<1x4x16xf32>
    %56 = vector.multi_reduction <maximumf>, %55, %cst_51 [2] : vector<1x4x2x16xf32> to vector<1x4x16xf32>
    %57 = vector.extract_strided_slice %56 {offsets = [0, 0, 0], sizes = [1, 4, 2], strides = [1, 1, 1]} : vector<1x4x16xf32> to vector<1x4x2xf32>
    %cst_52 = arith.constant dense<0xFF800000> : vector<1x4xf32>
    %58 = vector.multi_reduction <maximumf>, %57, %cst_52 [2] : vector<1x4x2xf32> to vector<1x4xf32>
    %cst_53 = arith.constant 0.000000e+00 : f32
    %59 = vector.broadcast %cst_53 : f32 to vector<1x4xf32>
    %60 = arith.maximumf %58, %59 : vector<1x4xf32>
    %61 = vector.extract_strided_slice %56 {offsets = [0, 0, 2], sizes = [1, 4, 3], strides = [1, 1, 1]} : vector<1x4x16xf32> to vector<1x4x3xf32>
    %cst_54 = arith.constant dense<0xFF800000> : vector<1x4xf32>
    %62 = vector.multi_reduction <maximumf>, %61, %cst_54 [2] : vector<1x4x3xf32> to vector<1x4xf32>
    %cst_55 = arith.constant 0.000000e+00 : f32
    %63 = vector.broadcast %cst_55 : f32 to vector<1x4xf32>
    %64 = arith.maximumf %62, %63 : vector<1x4xf32>
    %65 = vector.extract_strided_slice %56 {offsets = [0, 0, 5], sizes = [1, 4, 3], strides = [1, 1, 1]} : vector<1x4x16xf32> to vector<1x4x3xf32>
    %cst_56 = arith.constant dense<0xFF800000> : vector<1x4xf32>
    %66 = vector.multi_reduction <maximumf>, %65, %cst_56 [2] : vector<1x4x3xf32> to vector<1x4xf32>
    %cst_57 = arith.constant 0.000000e+00 : f32
    %67 = vector.broadcast %cst_57 : f32 to vector<1x4xf32>
    %68 = arith.maximumf %66, %67 : vector<1x4xf32>
    %69 = vector.extract_strided_slice %56 {offsets = [0, 0, 8], sizes = [1, 4, 3], strides = [1, 1, 1]} : vector<1x4x16xf32> to vector<1x4x3xf32>
    %cst_58 = arith.constant dense<0xFF800000> : vector<1x4xf32>
    %70 = vector.multi_reduction <maximumf>, %69, %cst_58 [2] : vector<1x4x3xf32> to vector<1x4xf32>
    %cst_59 = arith.constant 0.000000e+00 : f32
    %71 = vector.broadcast %cst_59 : f32 to vector<1x4xf32>
    %72 = arith.maximumf %70, %71 : vector<1x4xf32>
    %73 = vector.extract_strided_slice %56 {offsets = [0, 0, 11], sizes = [1, 4, 3], strides = [1, 1, 1]} : vector<1x4x16xf32> to vector<1x4x3xf32>
    %cst_60 = arith.constant dense<0xFF800000> : vector<1x4xf32>
    %74 = vector.multi_reduction <maximumf>, %73, %cst_60 [2] : vector<1x4x3xf32> to vector<1x4xf32>
    %cst_61 = arith.constant 0.000000e+00 : f32
    %75 = vector.broadcast %cst_61 : f32 to vector<1x4xf32>
    %76 = arith.maximumf %74, %75 : vector<1x4xf32>
    %77 = vector.extract_strided_slice %56 {offsets = [0, 0, 14], sizes = [1, 4, 2], strides = [1, 1, 1]} : vector<1x4x16xf32> to vector<1x4x2xf32>
    %cst_62 = arith.constant dense<0xFF800000> : vector<1x4xf32>
    %78 = vector.multi_reduction <maximumf>, %77, %cst_62 [2] : vector<1x4x2xf32> to vector<1x4xf32>
    %cst_63 = arith.constant 0.000000e+00 : f32
    %79 = vector.broadcast %cst_63 : f32 to vector<1x4xf32>
    %80 = arith.maximumf %78, %79 : vector<1x4xf32>
    %c0_64 = arith.constant 0 : index
    %c0_65 = arith.constant 0 : index
    %c2 = arith.constant 2 : index
    %c0_66 = arith.constant 0 : index
    %81 = vector.load %arg2[%c0_64, %c0_65, %c2, %c0_66] : memref<1x4x16x16xf32, #tpu.memory_space<vmem>>, vector<1x4x3x16xf32>
    %cst_67 = arith.constant dense<0xFF800000> : vector<1x4x16xf32>
    %82 = vector.multi_reduction <maximumf>, %81, %cst_67 [2] : vector<1x4x3x16xf32> to vector<1x4x16xf32>
    %83 = vector.extract_strided_slice %82 {offsets = [0, 0, 0], sizes = [1, 4, 2], strides = [1, 1, 1]} : vector<1x4x16xf32> to vector<1x4x2xf32>
    %cst_68 = arith.constant dense<0xFF800000> : vector<1x4xf32>
    %84 = vector.multi_reduction <maximumf>, %83, %cst_68 [2] : vector<1x4x2xf32> to vector<1x4xf32>
    %cst_69 = arith.constant 0.000000e+00 : f32
    %85 = vector.broadcast %cst_69 : f32 to vector<1x4xf32>
    %86 = arith.maximumf %84, %85 : vector<1x4xf32>
    %87 = vector.extract_strided_slice %82 {offsets = [0, 0, 2], sizes = [1, 4, 3], strides = [1, 1, 1]} : vector<1x4x16xf32> to vector<1x4x3xf32>
    %cst_70 = arith.constant dense<0xFF800000> : vector<1x4xf32>
    %88 = vector.multi_reduction <maximumf>, %87, %cst_70 [2] : vector<1x4x3xf32> to vector<1x4xf32>
    %89 = vector.extract_strided_slice %82 {offsets = [0, 0, 5], sizes = [1, 4, 3], strides = [1, 1, 1]} : vector<1x4x16xf32> to vector<1x4x3xf32>
    %cst_71 = arith.constant dense<0xFF800000> : vector<1x4xf32>
    %90 = vector.multi_reduction <maximumf>, %89, %cst_71 [2] : vector<1x4x3xf32> to vector<1x4xf32>
    %91 = vector.extract_strided_slice %82 {offsets = [0, 0, 8], sizes = [1, 4, 3], strides = [1, 1, 1]} : vector<1x4x16xf32> to vector<1x4x3xf32>
    %cst_72 = arith.constant dense<0xFF800000> : vector<1x4xf32>
    %92 = vector.multi_reduction <maximumf>, %91, %cst_72 [2] : vector<1x4x3xf32> to vector<1x4xf32>
    %93 = vector.extract_strided_slice %82 {offsets = [0, 0, 11], sizes = [1, 4, 3], strides = [1, 1, 1]} : vector<1x4x16xf32> to vector<1x4x3xf32>
    %cst_73 = arith.constant dense<0xFF800000> : vector<1x4xf32>
    %94 = vector.multi_reduction <maximumf>, %93, %cst_73 [2] : vector<1x4x3xf32> to vector<1x4xf32>
    %95 = vector.extract_strided_slice %82 {offsets = [0, 0, 14], sizes = [1, 4, 2], strides = [1, 1, 1]} : vector<1x4x16xf32> to vector<1x4x2xf32>
    %cst_74 = arith.constant dense<0xFF800000> : vector<1x4xf32>
    %96 = vector.multi_reduction <maximumf>, %95, %cst_74 [2] : vector<1x4x2xf32> to vector<1x4xf32>
    %cst_75 = arith.constant 0.000000e+00 : f32
    %97 = vector.broadcast %cst_75 : f32 to vector<1x4xf32>
    %98 = arith.maximumf %96, %97 : vector<1x4xf32>
    %c0_76 = arith.constant 0 : index
    %c0_77 = arith.constant 0 : index
    %c5_78 = arith.constant 5 : index
    %c0_79 = arith.constant 0 : index
    %99 = vector.load %arg2[%c0_76, %c0_77, %c5_78, %c0_79] : memref<1x4x16x16xf32, #tpu.memory_space<vmem>>, vector<1x4x3x16xf32>
    %cst_80 = arith.constant dense<0xFF800000> : vector<1x4x16xf32>
    %100 = vector.multi_reduction <maximumf>, %99, %cst_80 [2] : vector<1x4x3x16xf32> to vector<1x4x16xf32>
    %101 = vector.extract_strided_slice %100 {offsets = [0, 0, 0], sizes = [1, 4, 2], strides = [1, 1, 1]} : vector<1x4x16xf32> to vector<1x4x2xf32>
    %cst_81 = arith.constant dense<0xFF800000> : vector<1x4xf32>
    %102 = vector.multi_reduction <maximumf>, %101, %cst_81 [2] : vector<1x4x2xf32> to vector<1x4xf32>
    %cst_82 = arith.constant 0.000000e+00 : f32
    %103 = vector.broadcast %cst_82 : f32 to vector<1x4xf32>
    %104 = arith.maximumf %102, %103 : vector<1x4xf32>
    %105 = vector.extract_strided_slice %100 {offsets = [0, 0, 2], sizes = [1, 4, 3], strides = [1, 1, 1]} : vector<1x4x16xf32> to vector<1x4x3xf32>
    %cst_83 = arith.constant dense<0xFF800000> : vector<1x4xf32>
    %106 = vector.multi_reduction <maximumf>, %105, %cst_83 [2] : vector<1x4x3xf32> to vector<1x4xf32>
    %107 = vector.extract_strided_slice %100 {offsets = [0, 0, 5], sizes = [1, 4, 3], strides = [1, 1, 1]} : vector<1x4x16xf32> to vector<1x4x3xf32>
    %cst_84 = arith.constant dense<0xFF800000> : vector<1x4xf32>
    %108 = vector.multi_reduction <maximumf>, %107, %cst_84 [2] : vector<1x4x3xf32> to vector<1x4xf32>
    %109 = vector.extract_strided_slice %100 {offsets = [0, 0, 8], sizes = [1, 4, 3], strides = [1, 1, 1]} : vector<1x4x16xf32> to vector<1x4x3xf32>
    %cst_85 = arith.constant dense<0xFF800000> : vector<1x4xf32>
    %110 = vector.multi_reduction <maximumf>, %109, %cst_85 [2] : vector<1x4x3xf32> to vector<1x4xf32>
    %111 = vector.extract_strided_slice %100 {offsets = [0, 0, 11], sizes = [1, 4, 3], strides = [1, 1, 1]} : vector<1x4x16xf32> to vector<1x4x3xf32>
    %cst_86 = arith.constant dense<0xFF800000> : vector<1x4xf32>
    %112 = vector.multi_reduction <maximumf>, %111, %cst_86 [2] : vector<1x4x3xf32> to vector<1x4xf32>
    %113 = vector.extract_strided_slice %100 {offsets = [0, 0, 14], sizes = [1, 4, 2], strides = [1, 1, 1]} : vector<1x4x16xf32> to vector<1x4x2xf32>
    %cst_87 = arith.constant dense<0xFF800000> : vector<1x4xf32>
    %114 = vector.multi_reduction <maximumf>, %113, %cst_87 [2] : vector<1x4x2xf32> to vector<1x4xf32>
    %cst_88 = arith.constant 0.000000e+00 : f32
    %115 = vector.broadcast %cst_88 : f32 to vector<1x4xf32>
    %116 = arith.maximumf %114, %115 : vector<1x4xf32>
    %c0_89 = arith.constant 0 : index
    %c0_90 = arith.constant 0 : index
    %c8_91 = arith.constant 8 : index
    %c0_92 = arith.constant 0 : index
    %117 = vector.load %arg2[%c0_89, %c0_90, %c8_91, %c0_92] : memref<1x4x16x16xf32, #tpu.memory_space<vmem>>, vector<1x4x3x16xf32>
    %cst_93 = arith.constant dense<0xFF800000> : vector<1x4x16xf32>
    %118 = vector.multi_reduction <maximumf>, %117, %cst_93 [2] : vector<1x4x3x16xf32> to vector<1x4x16xf32>
    %119 = vector.extract_strided_slice %118 {offsets = [0, 0, 0], sizes = [1, 4, 2], strides = [1, 1, 1]} : vector<1x4x16xf32> to vector<1x4x2xf32>
    %cst_94 = arith.constant dense<0xFF800000> : vector<1x4xf32>
    %120 = vector.multi_reduction <maximumf>, %119, %cst_94 [2] : vector<1x4x2xf32> to vector<1x4xf32>
    %cst_95 = arith.constant 0.000000e+00 : f32
    %121 = vector.broadcast %cst_95 : f32 to vector<1x4xf32>
    %122 = arith.maximumf %120, %121 : vector<1x4xf32>
    %123 = vector.extract_strided_slice %118 {offsets = [0, 0, 2], sizes = [1, 4, 3], strides = [1, 1, 1]} : vector<1x4x16xf32> to vector<1x4x3xf32>
    %cst_96 = arith.constant dense<0xFF800000> : vector<1x4xf32>
    %124 = vector.multi_reduction <maximumf>, %123, %cst_96 [2] : vector<1x4x3xf32> to vector<1x4xf32>
    %125 = vector.extract_strided_slice %118 {offsets = [0, 0, 5], sizes = [1, 4, 3], strides = [1, 1, 1]} : vector<1x4x16xf32> to vector<1x4x3xf32>
    %cst_97 = arith.constant dense<0xFF800000> : vector<1x4xf32>
    %126 = vector.multi_reduction <maximumf>, %125, %cst_97 [2] : vector<1x4x3xf32> to vector<1x4xf32>
    %127 = vector.extract_strided_slice %118 {offsets = [0, 0, 8], sizes = [1, 4, 3], strides = [1, 1, 1]} : vector<1x4x16xf32> to vector<1x4x3xf32>
    %cst_98 = arith.constant dense<0xFF800000> : vector<1x4xf32>
    %128 = vector.multi_reduction <maximumf>, %127, %cst_98 [2] : vector<1x4x3xf32> to vector<1x4xf32>
    %129 = vector.extract_strided_slice %118 {offsets = [0, 0, 11], sizes = [1, 4, 3], strides = [1, 1, 1]} : vector<1x4x16xf32> to vector<1x4x3xf32>
    %cst_99 = arith.constant dense<0xFF800000> : vector<1x4xf32>
    %130 = vector.multi_reduction <maximumf>, %129, %cst_99 [2] : vector<1x4x3xf32> to vector<1x4xf32>
    %131 = vector.extract_strided_slice %118 {offsets = [0, 0, 14], sizes = [1, 4, 2], strides = [1, 1, 1]} : vector<1x4x16xf32> to vector<1x4x2xf32>
    %cst_100 = arith.constant dense<0xFF800000> : vector<1x4xf32>
    %132 = vector.multi_reduction <maximumf>, %131, %cst_100 [2] : vector<1x4x2xf32> to vector<1x4xf32>
    %cst_101 = arith.constant 0.000000e+00 : f32
    %133 = vector.broadcast %cst_101 : f32 to vector<1x4xf32>
    %134 = arith.maximumf %132, %133 : vector<1x4xf32>
    %c0_102 = arith.constant 0 : index
    %c0_103 = arith.constant 0 : index
    %c11_104 = arith.constant 11 : index
    %c0_105 = arith.constant 0 : index
    %135 = vector.load %arg2[%c0_102, %c0_103, %c11_104, %c0_105] : memref<1x4x16x16xf32, #tpu.memory_space<vmem>>, vector<1x4x3x16xf32>
    %cst_106 = arith.constant dense<0xFF800000> : vector<1x4x16xf32>
    %136 = vector.multi_reduction <maximumf>, %135, %cst_106 [2] : vector<1x4x3x16xf32> to vector<1x4x16xf32>
    %137 = vector.extract_strided_slice %136 {offsets = [0, 0, 0], sizes = [1, 4, 2], strides = [1, 1, 1]} : vector<1x4x16xf32> to vector<1x4x2xf32>
    %cst_107 = arith.constant dense<0xFF800000> : vector<1x4xf32>
    %138 = vector.multi_reduction <maximumf>, %137, %cst_107 [2] : vector<1x4x2xf32> to vector<1x4xf32>
    %cst_108 = arith.constant 0.000000e+00 : f32
    %139 = vector.broadcast %cst_108 : f32 to vector<1x4xf32>
    %140 = arith.maximumf %138, %139 : vector<1x4xf32>
    %141 = vector.extract_strided_slice %136 {offsets = [0, 0, 2], sizes = [1, 4, 3], strides = [1, 1, 1]} : vector<1x4x16xf32> to vector<1x4x3xf32>
    %cst_109 = arith.constant dense<0xFF800000> : vector<1x4xf32>
    %142 = vector.multi_reduction <maximumf>, %141, %cst_109 [2] : vector<1x4x3xf32> to vector<1x4xf32>
    %143 = vector.extract_strided_slice %136 {offsets = [0, 0, 5], sizes = [1, 4, 3], strides = [1, 1, 1]} : vector<1x4x16xf32> to vector<1x4x3xf32>
    %cst_110 = arith.constant dense<0xFF800000> : vector<1x4xf32>
    %144 = vector.multi_reduction <maximumf>, %143, %cst_110 [2] : vector<1x4x3xf32> to vector<1x4xf32>
    %145 = vector.extract_strided_slice %136 {offsets = [0, 0, 8], sizes = [1, 4, 3], strides = [1, 1, 1]} : vector<1x4x16xf32> to vector<1x4x3xf32>
    %cst_111 = arith.constant dense<0xFF800000> : vector<1x4xf32>
    %146 = vector.multi_reduction <maximumf>, %145, %cst_111 [2] : vector<1x4x3xf32> to vector<1x4xf32>
    %147 = vector.extract_strided_slice %136 {offsets = [0, 0, 11], sizes = [1, 4, 3], strides = [1, 1, 1]} : vector<1x4x16xf32> to vector<1x4x3xf32>
    %cst_112 = arith.constant dense<0xFF800000> : vector<1x4xf32>
    %148 = vector.multi_reduction <maximumf>, %147, %cst_112 [2] : vector<1x4x3xf32> to vector<1x4xf32>
    %149 = vector.extract_strided_slice %136 {offsets = [0, 0, 14], sizes = [1, 4, 2], strides = [1, 1, 1]} : vector<1x4x16xf32> to vector<1x4x2xf32>
    %cst_113 = arith.constant dense<0xFF800000> : vector<1x4xf32>
    %150 = vector.multi_reduction <maximumf>, %149, %cst_113 [2] : vector<1x4x2xf32> to vector<1x4xf32>
    %cst_114 = arith.constant 0.000000e+00 : f32
    %151 = vector.broadcast %cst_114 : f32 to vector<1x4xf32>
    %152 = arith.maximumf %150, %151 : vector<1x4xf32>
    %c0_115 = arith.constant 0 : index
    %c0_116 = arith.constant 0 : index
    %c14 = arith.constant 14 : index
    %c0_117 = arith.constant 0 : index
    %153 = vector.load %arg2[%c0_115, %c0_116, %c14, %c0_117] : memref<1x4x16x16xf32, #tpu.memory_space<vmem>>, vector<1x4x2x16xf32>
    %cst_118 = arith.constant dense<0xFF800000> : vector<1x4x16xf32>
    %154 = vector.multi_reduction <maximumf>, %153, %cst_118 [2] : vector<1x4x2x16xf32> to vector<1x4x16xf32>
    %155 = vector.extract_strided_slice %154 {offsets = [0, 0, 0], sizes = [1, 4, 2], strides = [1, 1, 1]} : vector<1x4x16xf32> to vector<1x4x2xf32>
    %cst_119 = arith.constant dense<0xFF800000> : vector<1x4xf32>
    %156 = vector.multi_reduction <maximumf>, %155, %cst_119 [2] : vector<1x4x2xf32> to vector<1x4xf32>
    %cst_120 = arith.constant 0.000000e+00 : f32
    %157 = vector.broadcast %cst_120 : f32 to vector<1x4xf32>
    %158 = arith.maximumf %156, %157 : vector<1x4xf32>
    %159 = vector.extract_strided_slice %154 {offsets = [0, 0, 2], sizes = [1, 4, 3], strides = [1, 1, 1]} : vector<1x4x16xf32> to vector<1x4x3xf32>
    %cst_121 = arith.constant dense<0xFF800000> : vector<1x4xf32>
    %160 = vector.multi_reduction <maximumf>, %159, %cst_121 [2] : vector<1x4x3xf32> to vector<1x4xf32>
    %cst_122 = arith.constant 0.000000e+00 : f32
    %161 = vector.broadcast %cst_122 : f32 to vector<1x4xf32>
    %162 = arith.maximumf %160, %161 : vector<1x4xf32>
    %163 = vector.extract_strided_slice %154 {offsets = [0, 0, 5], sizes = [1, 4, 3], strides = [1, 1, 1]} : vector<1x4x16xf32> to vector<1x4x3xf32>
    %cst_123 = arith.constant dense<0xFF800000> : vector<1x4xf32>
    %164 = vector.multi_reduction <maximumf>, %163, %cst_123 [2] : vector<1x4x3xf32> to vector<1x4xf32>
    %cst_124 = arith.constant 0.000000e+00 : f32
    %165 = vector.broadcast %cst_124 : f32 to vector<1x4xf32>
    %166 = arith.maximumf %164, %165 : vector<1x4xf32>
    %167 = vector.extract_strided_slice %154 {offsets = [0, 0, 8], sizes = [1, 4, 3], strides = [1, 1, 1]} : vector<1x4x16xf32> to vector<1x4x3xf32>
    %cst_125 = arith.constant dense<0xFF800000> : vector<1x4xf32>
    %168 = vector.multi_reduction <maximumf>, %167, %cst_125 [2] : vector<1x4x3xf32> to vector<1x4xf32>
    %cst_126 = arith.constant 0.000000e+00 : f32
    %169 = vector.broadcast %cst_126 : f32 to vector<1x4xf32>
    %170 = arith.maximumf %168, %169 : vector<1x4xf32>
    %171 = vector.extract_strided_slice %154 {offsets = [0, 0, 11], sizes = [1, 4, 3], strides = [1, 1, 1]} : vector<1x4x16xf32> to vector<1x4x3xf32>
    %cst_127 = arith.constant dense<0xFF800000> : vector<1x4xf32>
    %172 = vector.multi_reduction <maximumf>, %171, %cst_127 [2] : vector<1x4x3xf32> to vector<1x4xf32>
    %cst_128 = arith.constant 0.000000e+00 : f32
    %173 = vector.broadcast %cst_128 : f32 to vector<1x4xf32>
    %174 = arith.maximumf %172, %173 : vector<1x4xf32>
    %175 = vector.extract_strided_slice %154 {offsets = [0, 0, 14], sizes = [1, 4, 2], strides = [1, 1, 1]} : vector<1x4x16xf32> to vector<1x4x2xf32>
    %cst_129 = arith.constant dense<0xFF800000> : vector<1x4xf32>
    %176 = vector.multi_reduction <maximumf>, %175, %cst_129 [2] : vector<1x4x2xf32> to vector<1x4xf32>
    %cst_130 = arith.constant 0.000000e+00 : f32
    %177 = vector.broadcast %cst_130 : f32 to vector<1x4xf32>
    %178 = arith.maximumf %176, %177 : vector<1x4xf32>
    %179 = vector.shape_cast %2 : vector<1x4xf32> to vector<1x1x4xf32>
    %180 = vector.shape_cast %6 : vector<1x4xf32> to vector<1x1x4xf32>
    %181 = vector.shape_cast %8 : vector<1x4xf32> to vector<1x1x4xf32>
    %182 = vector.shape_cast %12 : vector<1x4xf32> to vector<1x1x4xf32>
    %183 = vector.shape_cast %14 : vector<1x4xf32> to vector<1x1x4xf32>
    %184 = vector.shape_cast %20 : vector<1x4xf32> to vector<1x1x4xf32>
    %185 = vector.shape_cast %24 : vector<1x4xf32> to vector<1x1x4xf32>
    %186 = vector.shape_cast %28 : vector<1x4xf32> to vector<1x1x4xf32>
    %187 = vector.shape_cast %34 : vector<1x4xf32> to vector<1x1x4xf32>
    %188 = vector.shape_cast %36 : vector<1x4xf32> to vector<1x1x4xf32>
    %189 = vector.shape_cast %40 : vector<1x4xf32> to vector<1x1x4xf32>
    %190 = vector.shape_cast %46 : vector<1x4xf32> to vector<1x1x4xf32>
    %191 = vector.shape_cast %50 : vector<1x4xf32> to vector<1x1x4xf32>
    %192 = vector.shape_cast %54 : vector<1x4xf32> to vector<1x1x4xf32>
    %193 = vector.shape_cast %60 : vector<1x4xf32> to vector<1x1x4xf32>
    %194 = vector.shape_cast %64 : vector<1x4xf32> to vector<1x1x4xf32>
    %195 = vector.shape_cast %68 : vector<1x4xf32> to vector<1x1x4xf32>
    %196 = vector.shape_cast %72 : vector<1x4xf32> to vector<1x1x4xf32>
    %197 = vector.shape_cast %76 : vector<1x4xf32> to vector<1x1x4xf32>
    %198 = vector.shape_cast %80 : vector<1x4xf32> to vector<1x1x4xf32>
    %199 = vector.shape_cast %86 : vector<1x4xf32> to vector<1x1x4xf32>
    %200 = vector.shape_cast %88 : vector<1x4xf32> to vector<1x1x4xf32>
    %201 = vector.shape_cast %90 : vector<1x4xf32> to vector<1x1x4xf32>
    %202 = vector.shape_cast %92 : vector<1x4xf32> to vector<1x1x4xf32>
    %203 = vector.shape_cast %94 : vector<1x4xf32> to vector<1x1x4xf32>
    %204 = vector.shape_cast %98 : vector<1x4xf32> to vector<1x1x4xf32>
    %205 = vector.shape_cast %104 : vector<1x4xf32> to vector<1x1x4xf32>
    %206 = vector.shape_cast %106 : vector<1x4xf32> to vector<1x1x4xf32>
    %207 = vector.shape_cast %108 : vector<1x4xf32> to vector<1x1x4xf32>
    %208 = vector.shape_cast %110 : vector<1x4xf32> to vector<1x1x4xf32>
    %209 = vector.shape_cast %112 : vector<1x4xf32> to vector<1x1x4xf32>
    %210 = vector.shape_cast %116 : vector<1x4xf32> to vector<1x1x4xf32>
    %211 = vector.shape_cast %122 : vector<1x4xf32> to vector<1x1x4xf32>
    %212 = vector.shape_cast %124 : vector<1x4xf32> to vector<1x1x4xf32>
    %213 = vector.shape_cast %126 : vector<1x4xf32> to vector<1x1x4xf32>
    %214 = vector.shape_cast %128 : vector<1x4xf32> to vector<1x1x4xf32>
    %215 = vector.shape_cast %130 : vector<1x4xf32> to vector<1x1x4xf32>
    %216 = vector.shape_cast %134 : vector<1x4xf32> to vector<1x1x4xf32>
    %217 = vector.shape_cast %140 : vector<1x4xf32> to vector<1x1x4xf32>
    %218 = vector.shape_cast %142 : vector<1x4xf32> to vector<1x1x4xf32>
    %219 = vector.shape_cast %144 : vector<1x4xf32> to vector<1x1x4xf32>
    %220 = vector.shape_cast %146 : vector<1x4xf32> to vector<1x1x4xf32>
    %221 = vector.shape_cast %148 : vector<1x4xf32> to vector<1x1x4xf32>
    %222 = vector.shape_cast %152 : vector<1x4xf32> to vector<1x1x4xf32>
    %223 = vector.shape_cast %158 : vector<1x4xf32> to vector<1x1x4xf32>
    %224 = vector.shape_cast %162 : vector<1x4xf32> to vector<1x1x4xf32>
    %225 = vector.shape_cast %166 : vector<1x4xf32> to vector<1x1x4xf32>
    %226 = vector.shape_cast %170 : vector<1x4xf32> to vector<1x1x4xf32>
    %227 = vector.shape_cast %174 : vector<1x4xf32> to vector<1x1x4xf32>
    %228 = vector.shape_cast %178 : vector<1x4xf32> to vector<1x1x4xf32>
    %229 = tpu.concatenate %179, %180, %181, %182, %183, %184, %185, %186, %187, %188, %189, %190, %191, %192, %193, %194 in 1 : vector<1x1x4xf32>, vector<1x1x4xf32>, vector<1x1x4xf32>, vector<1x1x4xf32>, vector<1x1x4xf32>, vector<1x1x4xf32>, vector<1x1x4xf32>, vector<1x1x4xf32>, vector<1x1x4xf32>, vector<1x1x4xf32>, vector<1x1x4xf32>, vector<1x1x4xf32>, vector<1x1x4xf32>, vector<1x1x4xf32>, vector<1x1x4xf32>, vector<1x1x4xf32> -> vector<1x16x4xf32>
    %230 = tpu.concatenate %195, %196, %197, %198, %199, %200, %201, %202, %203, %204, %205, %206, %207, %208, %209, %210 in 1 : vector<1x1x4xf32>, vector<1x1x4xf32>, vector<1x1x4xf32>, vector<1x1x4xf32>, vector<1x1x4xf32>, vector<1x1x4xf32>, vector<1x1x4xf32>, vector<1x1x4xf32>, vector<1x1x4xf32>, vector<1x1x4xf32>, vector<1x1x4xf32>, vector<1x1x4xf32>, vector<1x1x4xf32>, vector<1x1x4xf32>, vector<1x1x4xf32>, vector<1x1x4xf32> -> vector<1x16x4xf32>
    %231 = tpu.concatenate %211, %212, %213, %214, %215, %216, %217, %218, %219, %220, %221, %222, %223, %224, %225, %226 in 1 : vector<1x1x4xf32>, vector<1x1x4xf32>, vector<1x1x4xf32>, vector<1x1x4xf32>, vector<1x1x4xf32>, vector<1x1x4xf32>, vector<1x1x4xf32>, vector<1x1x4xf32>, vector<1x1x4xf32>, vector<1x1x4xf32>, vector<1x1x4xf32>, vector<1x1x4xf32>, vector<1x1x4xf32>, vector<1x1x4xf32>, vector<1x1x4xf32>, vector<1x1x4xf32> -> vector<1x16x4xf32>
    %232 = tpu.concatenate %227, %228 in 1 : vector<1x1x4xf32>, vector<1x1x4xf32> -> vector<1x2x4xf32>
    %233 = tpu.concatenate %229, %230, %231, %232 in 1 : vector<1x16x4xf32>, vector<1x16x4xf32>, vector<1x16x4xf32>, vector<1x2x4xf32> -> vector<1x50x4xf32>
    %c0_131 = arith.constant 0 : index
    %c0_132 = arith.constant 0 : index
    %c0_133 = arith.constant 0 : index
    %234 = vector.load %arg3[%c0_131, %c0_132, %c0_133] : memref<1x50x4xf32, #tpu.memory_space<vmem>>, vector<1x50x4xf32>
    tpu.vector_store %arg3[%c0_131, %c0_132, %c0_133], %233 {strides = array<i32>} : memref<1x50x4xf32, #tpu.memory_space<vmem>>, vector<1x50x4xf32>,
    return
  }
  func.func @transform_0(%arg0: i32, %arg1: i32) -> (i32, i32, i32, i32) {
    %c0_i32 = arith.constant 0 : i32
    %c0_i32_0 = arith.constant 0 : i32
    %c0_i32_1 = arith.constant 0 : i32
    return %arg0, %arg1, %c0_i32, %c0_i32_0 : i32, i32, i32, i32
  }
  func.func @transform_1(%arg0: i32, %arg1: i32) -> (i32, i32, i32) {
    %c0_i32 = arith.constant 0 : i32
    %c0_i32_0 = arith.constant 0 : i32
    return %arg0, %c0_i32, %arg1 : i32, i32, i32
  }
}

</mosaic_0001>

<bundles_post_ra>
// kernel: tpu_custom_call.1
= control target key start
LH: loop header
LB: loop body
LE: loop exit
PB: predicated region body
PF: predicated region fallthrough
CT: control target
= control target key end

     0   :  { %6 = vsyncpa [#allocation3], 0  ;;  %s1971_s0 = inlined_call_operand.hbm [shape: f32[2,4,16,16], index: 0, kind: input, shape index: {}]   ;;  %s1972_s1 = inlined_call_operand.vmem [shape: f32[2,50,4], index: 1, kind: output, shape index: {}]  }
   0x1   :  { %8 = vsyncpa [#allocation3 + $0x1], 0  ;;  %s1456_s6 = smov 0   ;;  %s1458_s7 = smov 0  }
   0x2   :  { %s1460_s8 = smov 0   ;;  %s1462_s9 = smov 0  }
   0x3   :  { %s1464_s10 = smov 0   ;;  %s1466_s11 = smov 0  }
   0x4 LB: > { %s1290_s12 = sadd.s32 4294967295, %s1441_s11   ;;  %s26_s13 = sadd.s32 1, %s1437_s10  ;;  %s1441_s11 = sphi %s1466_s11, %s14_s11   ;;  %s1437_s10 = sphi %s1464_s10, %s1980_s10   ;;  %s1433_s9 = sphi %s1462_s9, %s1979_s9   ;;  %s1429_s8 = sphi %s1460_s8, %s1978_s8   ;;  %s1425_s7 = sphi %s1458_s7, %s1977_s7   ;;  %s1421_s6 = sphi %s1456_s6, %s1976_s6  }
   0x5   : > { %p28_p0 = scmp.ge.s32.totalorder %s26_s13, 2  ;;  %s35_s14 = sadd.s32 1, %s1429_s8 }
   0x6   : > { %p42_p1 = scmp.ne.s32.totalorder %s1429_s8, %s1425_s7  ;;  %p43_p2 = scmp.eq.s32.totalorder %s1441_s11, 0 }
   0x7   : > { %s1982_s13 = smov (%p28_p0, %s26_s13), 0  ;;  %p48_p4 = scmp.ne.s32.totalorder %s1425_s7, %s1421_s6 }
   0x8   : > { %p1492_p3 = por %p43_p2, %p42_p1  ;;  %s30_s16 = ssub.s32 %s1437_s10, %s1982_s13 }
   0x9   : > { %p49_p5 = scmp.eq.s32.totalorder %s1290_s12, 0  ;;  %p33_p6 = scmp.eq.s32.totalorder %s30_s16, 0 }
   0xa   : > { %p1310_p8 = scmp.lt.s32.totalorder %s1441_s11, 2  ;;  %s100_s19 = sand.u32 1, %s1429_s8  }
   0xb   : > { %p1499_p7 = por %p49_p5, %p48_p4  ;;  %s1302_s20 = sshll.u32 %s1437_s10, 10 }
   0xc   : > { %s1505_s18 = scalar_select %p33_p6, %s1429_s8, %s35_s14  }
   0xd   : > { %s1294_s21 = sshll.u32 %s100_s19, 6  ;;  %s1512_s24 = scalar_lea.hbm %s1971_s0, %s1302_s20 }
   0xe   : > { %s104_s25 = scalar_lea.vmem [#allocation2], %s1294_s21  ;;  %p1516_p9 = pnand %p1310_p8, %p1492_p3 }
   0xf   : > { %s114_s26 = sshll.u32 %s104_s25, 4  ;;  %s1522_s28 = scalar_lea.sflag [#allocation3], %s100_s19  ;;  %s1520_s26 = int_to_ptr.vmem [resolvable:$true] %s114_s26 }
  0x10   : > { %s1361_s29 = scalar_lea.hbm %s1512_s24, 1024  ;;  %p1363_p11 = pneg %p1516_p9 }
  0x11   : > { %p1362_p10 = scmp.ne.s32.totalorder %s1512_s24, %s1361_s29  ;;  %s1366_s3 = scalar_lea.hbm %s1971_s0, 2048 }
  0x12   : > { %p1367_p0 = scmp.lt.u32.totalorder %s1512_s24, %s1971_s0  ;;  %p1368_p1 = scmp.lt.u32.totalorder %s1366_s3, %s1361_s29 }
  0x13   : > { %p1364_p12 = pnand %p1363_p11, %p1362_p10  ;;  %p1370_p3 = scmp.lt.u32.totalorder %s1361_s29, %s1512_s24 }
  0x14   : > { %p1369_p2 = por %p1368_p1, %p1367_p0 }
  0x15   : > { %p1365_p13 = pneg %p1364_p12 }
  0x16   : > { %p1371_p4 = por %p1370_p3, %p1369_p2 }
  0x18   : > { %p1372_p5 = pnand %p1371_p4, %p1365_p13 }
  0x1a   : > { %1375 = shalt.err (!%p1372_p5)
}
  0x1b   : > { %s1376_s6 = scalar_lea.vmem %s1520_s26, 1024  ;;  %s1443_s12 = smov [#allocation2]  }
  0x1c   : > { %p1377_p6 = scmp.ne.s32.totalorder %s1520_s26, %s1376_s6  ;;  %s1381_s14 = sshll.u32 %s1443_s12, 4  ;;  %s1382_s14 = int_to_ptr.vmem [resolvable:$false] %s1381_s14 }
  0x1d   : > { %s1383_s15 = scalar_lea.vmem %s1382_s14, 2048  ;;  %p1384_p12 = scmp.lt.s32.totalorder %s1520_s26, %s1382_s14 }
  0x1e   : > { %p1379_p8 = pnand %p1377_p6, %p1363_p11  ;;  %p1385_p0 = scmp.lt.s32.totalorder %s1383_s15, %s1376_s6 }
  0x20   : > { %p1380_p10 = pneg %p1379_p8  ;;  %p1386_p1 = por %p1385_p0, %p1384_p12 }
  0x22   : > { %p1387_p2 = pnand %p1386_p1, %p1380_p10 }
  0x24   : > { %1390 = shalt.err (!%p1387_p2)
}
  0x25   : > { %s1444_s16 = smov 128   ;;  %s1445_s19 = smov 8  }
  0x26   : > { %1309 = dma.hbm_to_vmem [thread:$0]  (!%p1516_p9), %s1512_s24, 1024, %s1520_s26, %s1522_s28, %s1444_s16, %s1444_s16, %s1445_s19  }
  0x27   : > { %p1297_p11 = scmp.ge.s32.totalorder %s1441_s11, 1  ;;  %p122_p13 = scmp.lt.s32.totalorder %s1441_s11, 3 }
  0x29   : > { %p123_p3 = pnand %p1297_p11, %p122_p13 }
  0x2a   : > { %s128_s20 = sand.u32 (!%p123_p3), 1, %s1425_s7  }
  0x2b   : > { %126 = sbr.rel (%p123_p3) target bundleno = 357 (0x165), region = 24  ;;  %s1298_s21 = sshll.u32 (!%p123_p3), %s128_s20, 6 }
  0x2c   : > { %s129_s22 = scalar_lea.sflag (!%p123_p3), [#allocation3], %s128_s20  ;;  %s1553_s23 = scalar_lea.vmem (!%p123_p3), [#allocation2], %s1298_s21 }
  0x32   : > { %1416 = dma.done.wait (%p1499_p7), %s129_s22, 1024  }
  0x33   : > { %1418 = vsyncadd (%p1499_p7), %s129_s22, 4294966272  ;;  %vm171_vm0 = vcmask 130048   ;;  %v163_v0 = vld [vmem:[%s1553_s23] sm:$0xff]  ;;  %v165_v1 = vld [vmem:[%s1553_s23 + $0x10] sm:$0xff]  ;;  %vm212_vm1 = vcmask 1041409   ;;  %vm305_vm2 = vcmask 126976  }
  0x34   : > { %v167_v2 = vld [vmem:[%s1553_s23 + $0x20] sm:$0xff]  ;;  %v169_v3 = vld [vmem:[%s1553_s23 + $0x30] sm:$0xff]  ;;  %v1564_v4 = vsel %vm171_vm0, %v163_v0, -inf  ;;  %v1567_v5 = vsel %vm171_vm0, %v165_v1, -inf  ;;  %v164_v7 = vld [vmem:[%s1553_s23 + $0x8] sm:$0xff]  ;;  %vm214_vm3 = vcmask 1042434  }
  0x35   : > { %v1570_v6 = vsel %vm171_vm0, %v167_v2, -inf  ;;  %v166_v8 = vld [vmem:[%s1553_s23 + $0x18] sm:$0xff]  ;;  %v1575_v9 = vsel %vm171_vm0, %v169_v3, -inf  ;;  %v223_v10 = vrot.slane %v1564_v4, 4  ;;  %v229_v11 = vrot.slane %v1567_v5, 4  ;;  %v168_v13 = vld [vmem:[%s1553_s23 + $0x28] sm:$0xff] }
  0x36   : > { %v235_v12 = vrot.slane %v1570_v6, 4  ;;  %v170_v14 = vld [vmem:[%s1553_s23 + $0x38] sm:$0xff]  ;;  %v241_v15 = vrot.slane %v1575_v9, 4  ;;  %v1584_v16 = vsel %vm171_vm0, %v164_v7, -inf  ;;  %v1587_v17 = vsel %vm171_vm0, %v166_v8, -inf  ;;  %p155_p7 = scmp.lt.s32.totalorder %s1433_s9, 1 }
  0x37   : > { %v1590_v18 = vsel %vm171_vm0, %v168_v13, -inf  ;;  %v224_v19 = vmax.f32 %v1564_v4, %v223_v10  ;;  %v230_v20 = vmax.f32 %v1567_v5, %v229_v11  ;;  %v1596_v22 = vsel %vm171_vm0, %v170_v14, -inf  ;;  %v301_v51 = vld [vmem:[%s1553_s23] sm:$0x1f]  ;;  %v302_v52 = vld [vmem:[%s1553_s23 + $0x10] sm:$0x1f] }
  0x38   : > { %v236_v21 = vmax.f32 %v1570_v6, %v235_v12  ;;  %vm216_vm4 = vcmask 1043459   ;;  %v242_v23 = vmax.f32 %v1575_v9, %v241_v15  ;;  %v263_v24 = vrot.slane %v1584_v16, 4  ;;  %v303_v63 = vld [vmem:[%s1553_s23 + $0x20] sm:$0x1f]  ;;  %v304_v10 = vld [vmem:[%s1553_s23 + $0x30] sm:$0x1f] }
  0x39   : > { %v269_v25 = vrot.slane %v1587_v17, 4  ;;  %v275_v26 = vrot.slane %v1590_v18, 4  ;;  %v225_v27 = vrot.slane %v224_v19, 2  ;;  %v231_v28 = vrot.slane %v230_v20, 2  ;;  %v357_v15 = vld [vmem:[%s1553_s23 + $0x5] sm:$0x3f] }
  0x3a   : > { %v237_v29 = vrot.slane %v236_v21, 2  ;;  %vm259_vm5 = vcmask 126016   ;;  %vm255_vm6 = vcmask 60416   ;;  %v281_v30 = vrot.slane %v1596_v22, 4  ;;  %s1984_s9 = smov (!%p155_p7, %s1433_s9), 1 }
  0x3b   : > { %v243_v31 = vrot.slane %v242_v23, 2  ;;  %v264_v32 = vmax.f32 %v1584_v16, %v263_v24  ;;  %v270_v33 = vmax.f32 %v1587_v17, %v269_v25  ;;  %v276_v34 = vmax.f32 %v1590_v18, %v275_v26  ;;  %s1303_s17 = smul.u32 56, %s1984_s9 }
  0x3c   : > { %v226_v35 = vmax.f32 %v224_v19, %v225_v27  ;;  %v232_v36 = vmax.f32 %v230_v20, %v231_v28  ;;  %v238_v37 = vmax.f32 %v236_v21, %v237_v29  ;;  %v282_v38 = vmax.f32 %v1596_v22, %v281_v30  ;;  %v358_v19 = vld [vmem:[%s1553_s23 + $0x15] sm:$0x3f]  ;;  %v359_v29 = vld [vmem:[%s1553_s23 + $0x25] sm:$0x3f] }
  0x3d   : > { %vm361_vm7 = vcmask 128000   ;;  %v244_v39 = vmax.f32 %v242_v23, %v243_v31  ;;  %v265_v40 = vrot.slane %v264_v32, 2  ;;  %v271_v41 = vrot.slane %v270_v33, 2  ;;  %s1854_s25 = scalar_lea.vmem %s1972_s1, %s1303_s17 }
  0x3e   : > { %v277_v42 = vrot.slane %v276_v34, 2  ;;  %v227_v43 = vrot.slane %v226_v35, 1  ;;  %v233_v44 = vrot.slane %v232_v36, 1  ;;  %v239_v45 = vrot.slane %v238_v37, 1 }
  0x3f   : > { %v283_v46 = vrot.slane %v282_v38, 2  ;;  %v245_v47 = vrot.slane %v244_v39, 1  ;;  %v266_v48 = vmax.f32 %v264_v32, %v265_v40  ;;  %v272_v49 = vmax.f32 %v270_v33, %v271_v41  ;;  %v360_v32 = vld [vmem:[%s1553_s23 + $0x35] sm:$0x3f] }
  0x40   : > { %v278_v50 = vmax.f32 %v276_v34, %v277_v42  ;;  %v228_v53 = vmax.f32 %v226_v35, %v227_v43  ;;  %v234_v54 = vmax.f32 %v232_v36, %v233_v44  ;;  %v240_v55 = vmax.f32 %v238_v37, %v239_v45 }
  0x41   : > { %v284_v56 = vmax.f32 %v282_v38, %v283_v46  ;;  %v246_v57 = vmax.f32 %v244_v39, %v245_v47  ;;  %v267_v58 = vrot.slane %v266_v48, 1  ;;  %v273_v59 = vrot.slane %v272_v49, 1 }
  0x42   : > { %v279_v60 = vrot.slane %v278_v50, 1  ;;  %v251_v61 = vsel %vm212_vm1, %v234_v54, %v228_v53  ;;  %v306_v0 = vsel %vm305_vm2, %v301_v51, -inf  ;;  %v313_v1 = vsel %vm305_vm2, %v302_v52, -inf }
  0x43   : > { %v285_v62 = vrot.slane %v284_v56, 1  ;;  %v252_v2 = vsel %vm214_vm3, %v240_v55, %v251_v61  ;;  %v268_v3 = vmax.f32 %v266_v48, %v267_v58  ;;  %v274_v7 = vmax.f32 %v272_v49, %v273_v59  ;;  %v461_v59 = vld [vmem:[%s1553_s23] sm:$0x3] }
  0x44   : > { %v280_v8 = vmax.f32 %v278_v50, %v279_v60  ;;  %v253_v11 = vsel %vm216_vm4, %v246_v57, %v252_v2  ;;  %v307_v13 = vrot.slane %v306_v0, 4  ;;  %v314_v14 = vrot.slane %v313_v1, 4 }
  0x45   : > { %v286_v12 = vmax.f32 %v284_v56, %v285_v62  ;;  %v260_v20 = vsel %vm259_vm5, %v253_v11, -inf  ;;  %v256_v21 = vsel %vm255_vm6, %v253_v11, -inf  ;;  %v291_v23 = vsel %vm212_vm1, %v274_v7, %v268_v3  ;;  %v462_v7 = vld [vmem:[%s1553_s23 + $0x10] sm:$0x3] }
  0x46   : > { %v320_v24 = vsel %vm305_vm2, %v303_v63, -inf  ;;  %vm465_vm8 = vcmask 123904   ;;  %261 = vmax.xlane.f32.xlu1 %v260_v20  ;;  %257 = vmax.xlane.f32.xlu0 %v256_v21  ;;  %v292_v25 = vsel %vm214_vm3, %v280_v8, %v291_v23  ;;  %v308_v26 = vmax.f32 %v306_v0, %v307_v13  ;;  %v463_v23 = vld [vmem:[%s1553_s23 + $0x20] sm:$0x3] }
  0x47   : > { %v315_v27 = vmax.f32 %v313_v1, %v314_v14  ;;  %v321_v28 = vrot.slane %v320_v24, 4  ;;  %v293_v30 = vsel %vm216_vm4, %v286_v12, %v292_v25  ;;  %v327_v31 = vsel %vm305_vm2, %v304_v10, -inf }
  0x48   : > { %v362_v33 = vsel %vm361_vm7, %v357_v15, -inf  ;;  %v369_v34 = vsel %vm361_vm7, %v358_v19, -inf  ;;  %v295_v35 = vsel %vm255_vm6, %v293_v30, -inf  ;;  %v298_v36 = vsel %vm259_vm5, %v293_v30, -inf }
  0x49   : > { %v309_v37 = vrot.slane %v308_v26, 2  ;;  %v316_v38 = vrot.slane %v315_v27, 2  ;;  %v322_v39 = vmax.f32 %v320_v24, %v321_v28  ;;  %v328_v40 = vrot.slane %v327_v31, 4  ;;  %v464_v24 = vld [vmem:[%s1553_s23 + $0x30] sm:$0x3] }
  0x4a   : > { %v363_v41 = vrot.slane %v362_v33, 4  ;;  %v370_v42 = vrot.slane %v369_v34, 4  ;;  %296 = vmax.xlane.f32.xlu1 %v295_v35  ;;  %299 = vmax.xlane.f32.xlu0 %v298_v36  ;;  %v376_v45 = vsel %vm361_vm7, %v359_v29, -inf  ;;  %v383_v46 = vsel %vm361_vm7, %v360_v32, -inf }
  0x4b   : > { %v310_v43 = vmax.f32 %v308_v26, %v309_v37  ;;  %v317_v44 = vmax.f32 %v315_v27, %v316_v38  ;;  %v323_v47 = vrot.slane %v322_v39, 2  ;;  %v329_v48 = vmax.f32 %v327_v31, %v328_v40  ;;  %v533_v40 = vld [vmem:[%s1553_s23 + $0x12] sm:$0x7] }
  0x4c   : > { %vm342_vm9 = vcmask 35840   ;;  %vm347_vm10 = vcmask 85032   ;;  %vm352_vm11 = vcmask 126040   ;;  %v364_v49 = vmax.f32 %v362_v33, %v363_v41 }
  0x4d   : > { %v371_v50 = vmax.f32 %v369_v34, %v370_v42  ;;  %v311_v51 = vrot.slane %v310_v43, 1  ;;  %v318_v52 = vrot.slane %v317_v44, 1  ;;  %v377_v53 = vrot.slane %v376_v45, 4 }
  0x4e   : > { %v384_v54 = vrot.slane %v383_v46, 4  ;;  %v324_v55 = vmax.f32 %v322_v39, %v323_v47  ;;  %v330_v56 = vrot.slane %v329_v48, 2  ;;  %v365_v57 = vrot.slane %v364_v49, 2  ;;  %v532_v39 = vld [vmem:[%s1553_s23 + $0x2] sm:$0x7] }
  0x4f   : > { %v372_v58 = vrot.slane %v371_v50, 2  ;;  %vm536_vm12 = vcmask 124928   ;;  %v312_v60 = vmax.f32 %v310_v43, %v311_v51  ;;  %v319_v61 = vmax.f32 %v317_v44, %v318_v52  ;;  %v534_v51 = vld [vmem:[%s1553_s23 + $0x22] sm:$0x7] }
  0x50   : > { %v378_v62 = vmax.f32 %v376_v45, %v377_v53  ;;  %v385_v63 = vmax.f32 %v383_v46, %v384_v54  ;;  %v325_v0 = vrot.slane %v324_v55, 1  ;;  %v331_v1 = vmax.f32 %v329_v48, %v330_v56 }
  0x51   : > { %v366_v2 = vmax.f32 %v364_v49, %v365_v57  ;;  %v373_v3 = vmax.f32 %v371_v50, %v372_v58  ;;  %v338_v8 = vsel %vm212_vm1, %v319_v61, %v312_v60  ;;  %v466_v12 = vsel %vm465_vm8, %v461_v59, -inf  ;;  %v535_v60 = vld [vmem:[%s1553_s23 + $0x32] sm:$0x7] }
  0x52   : > { %v379_v10 = vrot.slane %v378_v62, 2  ;;  %v386_v11 = vrot.slane %v385_v63, 2  ;;  %v326_v13 = vmax.f32 %v324_v55, %v325_v0  ;;  %v332_v14 = vrot.slane %v331_v1, 1 }
  0x53   : > { %v367_v15 = vrot.slane %v366_v2, 1  ;;  %v374_v19 = vrot.slane %v373_v3, 1  ;;  %v467_v25 = vrot.slane %v466_v12, 4  ;;  %v473_v26 = vsel %vm465_vm8, %v462_v7, -inf }
  0x54   : > { %v380_v20 = vmax.f32 %v378_v62, %v379_v10  ;;  %v387_v21 = vmax.f32 %v385_v63, %v386_v11  ;;  %v333_v27 = vmax.f32 %v331_v1, %v332_v14  ;;  %v339_v28 = vsel %vm214_vm3, %v326_v13, %v338_v8  ;;  %v653_v11 = vld [vmem:[%s1553_s23 + $0x8] sm:$0x7] }
  0x55   : > { %v368_v29 = vmax.f32 %v366_v2, %v367_v15  ;;  %v375_v30 = vmax.f32 %v373_v3, %v374_v19  ;;  %v468_v33 = vmax.f32 %v466_v12, %v467_v25  ;;  %v474_v34 = vrot.slane %v473_v26, 4 }
  0x56   : > { %v381_v31 = vrot.slane %v380_v20, 1  ;;  %v388_v32 = vrot.slane %v387_v21, 1  ;;  %v340_v35 = vsel %vm216_vm4, %v333_v27, %v339_v28  ;;  %v480_v37 = vsel %vm465_vm8, %v463_v23, -inf }
  0x57   : > { %v394_v36 = vsel %vm212_vm1, %v375_v30, %v368_v29  ;;  %v487_v38 = vsel %vm465_vm8, %v464_v24, -inf  ;;  %v343_v41 = vsel %vm342_vm9, %v340_v35, -inf  ;;  %v348_v42 = vsel %vm347_vm10, %v340_v35, -inf }
  0x58   : > { %v353_v43 = vsel %vm352_vm11, %v340_v35, -inf  ;;  %v382_v44 = vmax.f32 %v380_v20, %v381_v31  ;;  %344 = vmax.xlane.f32.xlu1 %v343_v41  ;;  %349 = vmax.xlane.f32.xlu0 %v348_v42  ;;  %v389_v45 = vmax.f32 %v387_v21, %v388_v32  ;;  %v469_v46 = vrot.slane %v468_v33, 2  ;;  %v654_v32 = vld [vmem:[%s1553_s23 + $0x18] sm:$0x7] }
  0x59   : > { %v475_v47 = vmax.f32 %v473_v26, %v474_v34  ;;  %v481_v48 = vrot.slane %v480_v37, 4  ;;  %v488_v50 = vrot.slane %v487_v38, 4  ;;  %v537_v52 = vsel %vm536_vm12, %v532_v39, -inf }
  0x5a   : > { %v395_v49 = vsel %vm214_vm3, %v382_v44, %v394_v36  ;;  %v544_v53 = vsel %vm536_vm12, %v533_v40, -inf  ;;  %v470_v55 = vmax.f32 %v468_v33, %v469_v46  ;;  %vm512_vm13 = vcmask 60456  }
  0x5b   : > { %v1655_v54 = vsel %vm216_vm4, %v389_v45, %v395_v49  ;;  %v476_v56 = vrot.slane %v475_v47, 2  ;;  %v482_v57 = vmax.f32 %v480_v37, %v481_v48  ;;  %v489_v59 = vmax.f32 %v487_v38, %v488_v50  ;;  %v656_v50 = vld [vmem:[%s1553_s23 + $0x38] sm:$0x7] }
  0x5c   : > { %v398_v58 = vsel %vm342_vm9, %v1655_v54, -inf  ;;  %vm517_vm14 = vcmask 85056   ;;  %v538_v61 = vrot.slane %v537_v52, 4  ;;  %v545_v62 = vrot.slane %v544_v53, 4  ;;  %354 = vmax.xlane.f32.xlu1 %v353_v43  ;;  %v655_v43 = vld [vmem:[%s1553_s23 + $0x28] sm:$0x7] }
  0x5d   : > { %399 = vmax.xlane.f32.xlu0 %v398_v58  ;;  %v471_v63 = vrot.slane %v470_v55, 1  ;;  %v477_v0 = vmax.f32 %v475_v47, %v476_v56  ;;  %v483_v1 = vrot.slane %v482_v57, 2  ;;  %v551_v2 = vsel %vm536_vm12, %v534_v51, -inf }
  0x5e   : > { %v490_v3 = vrot.slane %v489_v59, 2  ;;  %v539_v7 = vmax.f32 %v537_v52, %v538_v61  ;;  %v546_v8 = vmax.f32 %v544_v53, %v545_v62  ;;  %v552_v10 = vrot.slane %v551_v2, 4 }
  0x5f   : > { %v472_v12 = vmax.f32 %v470_v55, %v471_v63  ;;  %v478_v13 = vrot.slane %v477_v0, 1  ;;  %v484_v14 = vmax.f32 %v482_v57, %v483_v1  ;;  %v558_v15 = vsel %vm536_vm12, %v535_v60, -inf }
  0x60   : > { %v491_v19 = vmax.f32 %v489_v59, %v490_v3  ;;  %v540_v20 = vrot.slane %v539_v7, 2  ;;  %v547_v21 = vrot.slane %v546_v8, 2  ;;  %v553_v23 = vmax.f32 %v551_v2, %v552_v10 }
  0x61   : > { %v479_v24 = vmax.f32 %v477_v0, %v478_v13  ;;  %v485_v25 = vrot.slane %v484_v14, 1  ;;  %v559_v26 = vrot.slane %v558_v15, 4  ;;  %v657_v27 = vsel %vm536_vm12, %v653_v11, -inf }
  0x62   : > { %v492_v28 = vrot.slane %v491_v19, 1  ;;  %v541_v29 = vmax.f32 %v539_v7, %v540_v20  ;;  %v548_v30 = vmax.f32 %v546_v8, %v547_v21  ;;  %v554_v31 = vrot.slane %v553_v23, 2 }
  0x63   : > { %v486_v33 = vmax.f32 %v484_v14, %v485_v25  ;;  %v498_v34 = vsel %vm212_vm1, %v479_v24, %v472_v12  ;;  %vm527_vm15 = vcmask 126064   ;;  %v560_v35 = vmax.f32 %v558_v15, %v559_v26  ;;  %v593_v24 = vld [vmem:[%s1553_s23 + $0x5] sm:$0x7] }
  0x64   : > { %v658_v36 = vrot.slane %v657_v27, 4  ;;  %v493_v37 = vmax.f32 %v491_v19, %v492_v28  ;;  %v542_v38 = vrot.slane %v541_v29, 1  ;;  %v549_v39 = vrot.slane %v548_v30, 1 }
  0x65   : > { %v555_v40 = vmax.f32 %v553_v23, %v554_v31  ;;  %v499_v41 = vsel %vm214_vm3, %v486_v33, %v498_v34  ;;  %v561_v42 = vrot.slane %v560_v35, 2  ;;  %v664_v45 = vsel %vm536_vm12, %v654_v32, -inf }
  0x66   : > { %v659_v44 = vmax.f32 %v657_v27, %v658_v36  ;;  %v1670_v46 = vsel %vm216_vm4, %v493_v37, %v499_v41  ;;  %v543_v47 = vmax.f32 %v541_v29, %v542_v38  ;;  %v550_v48 = vmax.f32 %v548_v30, %v549_v39  ;;  %v594_v41 = vld [vmem:[%s1553_s23 + $0x15] sm:$0x7] }
  0x67   : > { %v556_v49 = vrot.slane %v555_v40, 1  ;;  %v513_v51 = vsel %vm512_vm13, %v1670_v46, -inf  ;;  %v518_v52 = vsel %vm517_vm14, %v1670_v46, -inf  ;;  %v562_v53 = vmax.f32 %v560_v35, %v561_v42 }
  0x68   : > { %v660_v55 = vrot.slane %v659_v44, 2  ;;  %514 = vmax.xlane.f32.xlu1 %v513_v51  ;;  %519 = vmax.xlane.f32.xlu0 %v518_v52  ;;  %v569_v57 = vsel %vm212_vm1, %v550_v48, %v543_v47  ;;  %v665_v58 = vrot.slane %v664_v45, 4  ;;  %v671_v59 = vsel %vm536_vm12, %v655_v43, -inf  ;;  %v595_v51 = vld [vmem:[%s1553_s23 + $0x25] sm:$0x7] }
  0x69   : > { %v557_v56 = vmax.f32 %v555_v40, %v556_v49  ;;  %v563_v60 = vrot.slane %v562_v53, 1  ;;  %v672_v62 = vrot.slane %v671_v59, 4  ;;  %v678_v63 = vsel %vm536_vm12, %v656_v50, -inf }
  0x6a   : > { %v661_v61 = vmax.f32 %v659_v44, %v660_v55  ;;  %v666_v1 = vmax.f32 %v664_v45, %v665_v58  ;;  %v679_v2 = vrot.slane %v678_v63, 4  ;;  %v405_v3 = vsel %vm352_vm11, %v1655_v54, -inf  ;;  %v596_v55 = vld [vmem:[%s1553_s23 + $0x35] sm:$0x7] }
  0x6b   : > { %v570_v0 = vsel %vm214_vm3, %v557_v56, %v569_v57  ;;  %v564_v7 = vmax.f32 %v562_v53, %v563_v60  ;;  %v673_v10 = vmax.f32 %v671_v59, %v672_v62  ;;  %v174_v11 = vmax.f32 %v1564_v4, %v1584_v16 }
  0x6c   : > { %v662_v8 = vrot.slane %v661_v61, 1  ;;  %vm502_vm0 = vcmask 11264   ;;  %v667_v12 = vrot.slane %v666_v1, 2  ;;  %v680_v13 = vmax.f32 %v678_v63, %v679_v2 }
  0x6d   : > { %v183_v14 = vmax.f32 %v1567_v5, %v1587_v17  ;;  %v192_v15 = vmax.f32 %v1570_v6, %v1590_v18  ;;  %v1690_v19 = vsel %vm216_vm4, %v564_v7, %v570_v0  ;;  %v674_v21 = vrot.slane %v673_v10, 2 }
  0x6e   : > { %v663_v20 = vmax.f32 %v661_v61, %v662_v8  ;;  %v175_v23 = vrot.slane %v174_v11, 4  ;;  %v589_v25 = vsel %vm527_vm15, %v1690_v19, -inf  ;;  %v668_v4 = vmax.f32 %v666_v1, %v667_v12 }
  0x6f   : > { %v681_v16 = vrot.slane %v680_v13, 2  ;;  %v184_v26 = vrot.slane %v183_v14, 4  ;;  %590 = vmax.xlane.f32.xlu1 %v589_v25  ;;  %v675_v27 = vmax.f32 %v673_v10, %v674_v21  ;;  %v193_v5 = vrot.slane %v192_v15, 4  ;;  %v409_v10 = vld [vmem:[%s1553_s23 + $0xb] sm:$0x1f] }
  0x70   : > { %v176_v28 = vmax.f32 %v174_v11, %v175_v23  ;;  %v201_v6 = vmax.f32 %v1575_v9, %v1596_v22  ;;  %v669_v17 = vrot.slane %v668_v4, 1  ;;  %v597_v30 = vsel %vm536_vm12, %v593_v24, -inf }
  0x71   : > { %v682_v18 = vmax.f32 %v680_v13, %v681_v16  ;;  %v185_v29 = vmax.f32 %v183_v14, %v184_v26  ;;  %vm522_vm5 = vcmask 109656   ;;  %v676_v31 = vrot.slane %v675_v27, 1  ;;  %v411_v26 = vld [vmem:[%s1553_s23 + $0x2b] sm:$0x1f] }
  0x72   : > { %v177_v32 = vrot.slane %v176_v28, 2  ;;  %v194_v33 = vmax.f32 %v192_v15, %v193_v5  ;;  %v202_v34 = vrot.slane %v201_v6, 4  ;;  %v670_v35 = vmax.f32 %v668_v4, %v669_v17  ;;  %v410_v15 = vld [vmem:[%s1553_s23 + $0x1b] sm:$0x1f] }
  0x73   : > { %v683_v36 = vrot.slane %v682_v18, 1  ;;  %v186_v37 = vrot.slane %v185_v29, 2  ;;  %v598_v38 = vrot.slane %v597_v30, 4  ;;  %v677_v39 = vmax.f32 %v675_v27, %v676_v31  ;;  %406 = vmax.xlane.f32.xlu1 %v405_v3  ;;  %v412_v27 = vld [vmem:[%s1553_s23 + $0x3b] sm:$0x1f] }
  0x74   : > { %v178_v40 = vmax.f32 %v176_v28, %v177_v32  ;;  %v195_v9 = vrot.slane %v194_v33, 2  ;;  %v203_v22 = vmax.f32 %v201_v6, %v202_v34  ;;  %vm219_vm6 = vcmask 125952  }
  0x75   : > { %v684_v42 = vmax.f32 %v682_v18, %v683_v36  ;;  %v689_v43 = vsel %vm212_vm1, %v670_v35, %v663_v20  ;;  %v187_v44 = vmax.f32 %v185_v29, %v186_v37  ;;  %v599_v45 = vmax.f32 %v597_v30, %v598_v38 }
  0x76   : > { %v690_v47 = vsel %vm214_vm3, %v677_v39, %v689_v43  ;;  %v179_v48 = vrot.slane %v178_v40, 1  ;;  %v196_v49 = vmax.f32 %v194_v33, %v195_v9  ;;  %v204_v50 = vrot.slane %v203_v22, 2 }
  0x77   : > { %v1703_v52 = vsel %vm216_vm4, %v684_v42, %v690_v47  ;;  %v188_v53 = vrot.slane %v187_v44, 1  ;;  %v600_v56 = vrot.slane %v599_v45, 2  ;;  %v604_v57 = vsel %vm536_vm12, %v594_v41, -inf }
  0x78   : > { %v693_v58 = vsel %vm502_vm0, %v1703_v52, -inf  ;;  %v180_v59 = vmax.f32 %v178_v40, %v179_v48  ;;  %v197_v60 = vrot.slane %v196_v49, 1  ;;  %v205_v61 = vmax.f32 %v203_v22, %v204_v50 }
  0x79   : > { %694 = vmax.xlane.f32.xlu0 %v693_v58  ;;  %v189_v62 = vmax.f32 %v187_v44, %v188_v53  ;;  %v601_v63 = vmax.f32 %v599_v45, %v600_v56  ;;  %v605_v0 = vrot.slane %v604_v57, 4  ;;  %v611_v1 = vsel %vm536_vm12, %v595_v51, -inf  ;;  %v713_v51 = vld [vmem:[%s1553_s23 + $0xb] sm:$0x7]  ;;  %v714_v58 = vld [vmem:[%s1553_s23 + $0x1b] sm:$0x7] }
  0x7a   : > { %v198_v2 = vmax.f32 %v196_v49, %v197_v60  ;;  %v206_v3 = vrot.slane %v205_v61, 1  ;;  %v612_v7 = vrot.slane %v611_v1, 4  ;;  %v618_v8 = vsel %vm536_vm12, %v596_v55, -inf }
  0x7b   : > { %v213_v11 = vsel %vm212_vm1, %v189_v62, %v180_v59  ;;  %v602_v12 = vrot.slane %v601_v63, 1  ;;  %v606_v13 = vmax.f32 %v604_v57, %v605_v0  ;;  %v619_v14 = vrot.slane %v618_v8, 4 }
  0x7c   : > { %v207_v20 = vmax.f32 %v205_v61, %v206_v3  ;;  %v215_v21 = vsel %vm214_vm3, %v198_v2, %v213_v11  ;;  %v613_v23 = vmax.f32 %v611_v1, %v612_v7  ;;  %v523_v24 = vsel %vm522_vm5, %v1670_v46, -inf }
  0x7d   : > { %v603_v25 = vmax.f32 %v601_v63, %v602_v12  ;;  %v607_v4 = vrot.slane %v606_v13, 2  ;;  %v620_v16 = vmax.f32 %v618_v8, %v619_v14  ;;  %v413_v28 = vsel %vm305_vm2, %v409_v10, -inf  ;;  %v715_v63 = vld [vmem:[%s1553_s23 + $0x2b] sm:$0x7]  ;;  %v716_v10 = vld [vmem:[%s1553_s23 + $0x3b] sm:$0x7] }
  0x7e   : > { %v217_v5 = vsel %vm216_vm4, %v207_v20, %v215_v21  ;;  %v614_v6 = vrot.slane %v613_v23, 2  ;;  %v414_v17 = vrot.slane %v413_v28, 4  ;;  %v420_v18 = vsel %vm305_vm2, %v410_v15, -inf }
  0x7f   : > { %v220_v29 = vsel %vm219_vm6, %v217_v5, -inf  ;;  %v608_v30 = vmax.f32 %v606_v13, %v607_v4  ;;  %v621_v31 = vrot.slane %v620_v16, 2  ;;  %v421_v32 = vrot.slane %v420_v18, 4 }
  0x80   : > { %221 = vmax.xlane.f32.xlu0 %v220_v29  ;;  %v615_v33 = vmax.f32 %v613_v23, %v614_v6  ;;  %v415_v34 = vmax.f32 %v413_v28, %v414_v17  ;;  %v427_v35 = vsel %vm305_vm2, %v411_v26, -inf  ;;  %v434_v36 = vsel %vm305_vm2, %v412_v27, -inf  ;;  %v773_v29 = vld [vmem:[%s1553_s23 + $0xe] sm:$0x3] }
  0x81   : > { %v609_v37 = vrot.slane %v608_v30, 1  ;;  %v622_v38 = vmax.f32 %v620_v16, %v621_v31  ;;  %v422_v39 = vmax.f32 %v420_v18, %v421_v32  ;;  %v428_v40 = vrot.slane %v427_v35, 4 }
  0x82   : > { %v616_v9 = vrot.slane %v615_v33, 1  ;;  %v416_v22 = vrot.slane %v415_v34, 2  ;;  %v435_v41 = vrot.slane %v434_v36, 4  ;;  %vm507_vm7 = vcmask 35856  }
  0x83   : > { %v610_v42 = vmax.f32 %v608_v30, %v609_v37  ;;  %v623_v43 = vrot.slane %v622_v38, 1  ;;  %v423_v44 = vrot.slane %v422_v39, 2  ;;  %v429_v45 = vmax.f32 %v427_v35, %v428_v40  ;;  %v775_v35 = vld [vmem:[%s1553_s23 + $0x2e] sm:$0x3] }
  0x84   : > { %v617_v47 = vmax.f32 %v615_v33, %v616_v9  ;;  %524 = vmax.xlane.f32.xlu0 %v523_v24  ;;  %v417_v48 = vmax.f32 %v415_v34, %v416_v22  ;;  %v436_v49 = vmax.f32 %v434_v36, %v435_v41  ;;  %v402_v50 = vsel %vm347_vm10, %v1655_v54, -inf  ;;  %v774_v34 = vld [vmem:[%s1553_s23 + $0x1e] sm:$0x3] }
  0x85   : > { %v624_v53 = vmax.f32 %v622_v38, %v623_v43  ;;  %v629_v55 = vsel %vm212_vm1, %v610_v42, %v603_v25  ;;  %v424_v56 = vmax.f32 %v422_v39, %v423_v44  ;;  %v430_v57 = vrot.slane %v429_v45, 2  ;;  %v776_v22 = vld [vmem:[%s1553_s23 + $0x3e] sm:$0x3] }
  0x86   : > { %v630_v59 = vsel %vm214_vm3, %v617_v47, %v629_v55  ;;  %v418_v60 = vrot.slane %v417_v48, 1  ;;  %v437_v61 = vrot.slane %v436_v49, 2  ;;  %v528_v62 = vsel %vm527_vm15, %v1670_v46, -inf }
  0x87   : > { %v1735_v0 = vsel %vm216_vm4, %v624_v53, %v630_v59  ;;  %v425_v54 = vrot.slane %v424_v56, 1  ;;  %v431_v1 = vmax.f32 %v429_v45, %v430_v57  ;;  %v717_v2 = vsel %vm536_vm12, %v713_v51, -inf }
  0x88   : > { %v633_v3 = vsel %vm502_vm0, %v1735_v0, -inf  ;;  %v419_v7 = vmax.f32 %v417_v48, %v418_v60  ;;  %v438_v8 = vmax.f32 %v436_v49, %v437_v61  ;;  %403 = vmax.xlane.f32.xlu0 %v402_v50  ;;  %v718_v11 = vrot.slane %v717_v2, 4 }
  0x89   : > { %634 = vmax.xlane.f32.xlu1 %v633_v3  ;;  %v426_v12 = vmax.f32 %v424_v56, %v425_v54  ;;  %v432_v13 = vrot.slane %v431_v1, 1  ;;  %v724_v14 = vsel %vm536_vm12, %v714_v58, -inf  ;;  %v731_v15 = vsel %vm536_vm12, %v715_v63, -inf }
  0x8a   : > { %v439_v20 = vrot.slane %v438_v8, 1  ;;  %v719_v21 = vmax.f32 %v717_v2, %v718_v11  ;;  %v725_v23 = vrot.slane %v724_v14, 4  ;;  %v732_v24 = vrot.slane %v731_v15, 4 }
  0x8b   : > { %v433_v25 = vmax.f32 %v431_v1, %v432_v13  ;;  %v445_v4 = vsel %vm212_vm1, %v426_v12, %v419_v7  ;;  %v738_v16 = vsel %vm536_vm12, %v716_v10, -inf  ;;  %v697_v18 = vsel %vm507_vm7, %v1703_v52, -inf }
  0x8c   : > { %v440_v26 = vmax.f32 %v438_v8, %v439_v20  ;;  %529 = vmax.xlane.f32.xlu0 %v528_v62  ;;  %v720_v27 = vrot.slane %v719_v21, 2  ;;  %v726_v28 = vmax.f32 %v724_v14, %v725_v23  ;;  %v733_v5 = vmax.f32 %v731_v15, %v732_v24 }
  0x8d   : > { %v446_v6 = vsel %vm214_vm3, %v433_v25, %v445_v4  ;;  %v739_v17 = vrot.slane %v738_v16, 4  ;;  %v586_v37 = vsel %vm522_vm5, %v1690_v19, -inf  ;;  %v777_v41 = vsel %vm465_vm8, %v773_v29, -inf }
  0x8e   : > { %v1750_v30 = vsel %vm216_vm4, %v440_v26, %v446_v6  ;;  %v721_v31 = vmax.f32 %v719_v21, %v720_v27  ;;  %v727_v32 = vrot.slane %v726_v28, 2  ;;  %v734_v33 = vrot.slane %v733_v5, 2 }
  0x8f   : > { %v449_v36 = vsel %vm342_vm9, %v1750_v30, -inf  ;;  %v740_v38 = vmax.f32 %v738_v16, %v739_v17  ;;  %v778_v43 = vrot.slane %v777_v41, 4  ;;  %v784_v44 = vsel %vm465_vm8, %v774_v34, -inf }
  0x90   : > { %450 = vmax.xlane.f32.xlu1 %v449_v36  ;;  %v722_v39 = vrot.slane %v721_v31, 1  ;;  %v728_v40 = vmax.f32 %v726_v28, %v727_v32  ;;  %v735_v9 = vmax.f32 %v733_v5, %v734_v33  ;;  %698 = vmax.xlane.f32.xlu0 %v697_v18  ;;  %v791_v45 = vsel %vm465_vm8, %v775_v35, -inf }
  0x91   : > { %v741_v42 = vrot.slane %v740_v38, 2  ;;  %v785_v50 = vrot.slane %v784_v44, 4  ;;  %v779_v53 = vmax.f32 %v777_v41, %v778_v43  ;;  %v792_v55 = vrot.slane %v791_v45, 4 }
  0x92   : > { %v723_v47 = vmax.f32 %v721_v31, %v722_v39  ;;  %v729_v48 = vrot.slane %v728_v40, 1  ;;  %v736_v49 = vrot.slane %v735_v9, 1  ;;  %v798_v56 = vsel %vm465_vm8, %v776_v22, -inf }
  0x93   : > { %v742_v51 = vmax.f32 %v740_v38, %v741_v42  ;;  %v786_v59 = vmax.f32 %v784_v44, %v785_v50  ;;  %v799_v60 = vrot.slane %v798_v56, 4  ;;  %v780_v62 = vrot.slane %v779_v53, 2 }
  0x94   : > { %587 = vmax.xlane.f32.xlu1 %v586_v37  ;;  %v730_v57 = vmax.f32 %v728_v40, %v729_v48  ;;  %v737_v58 = vmax.f32 %v735_v9, %v736_v49  ;;  %v793_v63 = vmax.f32 %v791_v45, %v792_v55  ;;  %v453_v26 = vsel %vm347_vm10, %v1750_v30, -inf }
  0x95   : > { %v743_v61 = vrot.slane %v742_v51, 1  ;;  %v787_v1 = vrot.slane %v786_v59, 2  ;;  %v800_v2 = vmax.f32 %v798_v56, %v799_v60  ;;  %v781_v8 = vmax.f32 %v779_v53, %v780_v62 }
  0x96   : > { %v749_v54 = vsel %vm212_vm1, %v730_v57, %v723_v47  ;;  %v794_v10 = vrot.slane %v793_v63, 2  ;;  %v646_v6 = vsel %vm522_vm5, %v1735_v0, -inf  ;;  %v580_v17 = vsel %vm512_vm13, %v1690_v19, -inf }
  0x97   : > { %v744_v3 = vmax.f32 %v742_v51, %v743_v61  ;;  %v750_v7 = vsel %vm214_vm3, %v737_v58, %v749_v54  ;;  %v788_v11 = vmax.f32 %v786_v59, %v787_v1  ;;  %v801_v12 = vrot.slane %v800_v2, 2 }
  0x98   : > { %v782_v14 = vrot.slane %v781_v8, 1  ;;  %v795_v15 = vmax.f32 %v793_v63, %v794_v10  ;;  %v583_v31 = vsel %vm517_vm14, %v1690_v19, -inf  ;;  %v573_v32 = vsel %vm502_vm0, %v1690_v19, -inf }
  0x99   : > { %v1766_v13 = vsel %vm216_vm4, %v744_v3, %v750_v7  ;;  %v789_v24 = vrot.slane %v788_v11, 1  ;;  %v802_v4 = vmax.f32 %v800_v2, %v801_v12  ;;  %v700_v33 = vsel %vm512_vm13, %v1703_v52, -inf }
  0x9a   : > { %v760_v20 = vsel %vm512_vm13, %v1766_v13, -inf  ;;  %v763_v21 = vsel %vm517_vm14, %v1766_v13, -inf  ;;  %v783_v23 = vmax.f32 %v781_v8, %v782_v14  ;;  %v796_v25 = vrot.slane %v795_v15, 1 }
  0x9b   : > { %761 = vmax.xlane.f32.xlu1 %v760_v20  ;;  %764 = vmax.xlane.f32.xlu0 %v763_v21  ;;  %v769_v16 = vsel %vm527_vm15, %v1766_v13, -inf  ;;  %v790_v27 = vmax.f32 %v788_v11, %v789_v24  ;;  %v803_v5 = vrot.slane %v802_v4, 1  ;;  %v766_v40 = vsel %vm522_vm5, %v1766_v13, -inf }
  0x9c   : > { %v797_v28 = vmax.f32 %v795_v15, %v796_v25  ;;  %v457_v22 = vsel %vm352_vm11, %v1750_v30, -inf  ;;  %v637_v41 = vsel %vm507_vm7, %v1735_v0, -inf  ;;  %v703_v42 = vsel %vm517_vm14, %v1703_v52, -inf }
  0x9d   : > { %v804_v18 = vmax.f32 %v802_v4, %v803_v5  ;;  %v809_v29 = vsel %vm212_vm1, %v790_v27, %v783_v23  ;;  %v709_v43 = vsel %vm527_vm15, %v1703_v52, -inf  ;;  %v503_v45 = vsel %vm502_vm0, %v1670_v46, -inf }
  0x9e   : > { %v810_v34 = vsel %vm214_vm3, %v797_v28, %v809_v29  ;;  %v640_v30 = vsel %vm512_vm13, %v1735_v0, -inf  ;;  %v706_v47 = vsel %vm522_vm5, %v1703_v52, -inf  ;;  %v753_v48 = vsel %vm502_vm0, %v1766_v13, -inf }
  0x9f   : > { %770 = vmax.xlane.f32.xlu1 %v769_v16  ;;  %454 = vmax.xlane.f32.xlu0 %v453_v26  ;;  %v811_v35 = vsel %vm216_vm4, %v804_v18, %v810_v34  ;;  %v508_v49 = vsel %vm507_vm7, %v1670_v46, -inf  ;;  %v577_v50 = vsel %vm507_vm7, %v1690_v19, -inf  ;;  %v643_v51 = vsel %vm517_vm14, %v1735_v0, -inf }
  0xa0   : > { %v821_v36 = vsel %vm512_vm13, %v811_v35, -inf  ;;  %v825_v37 = vsel %vm517_vm14, %v811_v35, -inf  ;;  %v833_v38 = vsel %vm527_vm15, %v811_v35, -inf  ;;  %v829_v39 = vsel %vm522_vm5, %v811_v35, -inf }
  0xa1   : > { %v813_v9 = vsel %vm502_vm0, %v811_v35, -inf  ;;  %v817_v44 = vsel %vm507_vm7, %v811_v35, -inf  ;;  %v649_v52 = vsel %vm527_vm15, %v1735_v0, -inf  ;;  %v757_v46 = vsel %vm507_vm7, %v1766_v13, -inf }
  0xa2   : > { %v838_v0 = vlaneseq  ;;  %vm935_vm1 = vcmask 1040384   ;;  %vm937_vm2 = vcmask 1041408   ;;  %vm939_vm3 = vcmask 1042432  }
  0xa3   : > { %574 = vmax.xlane.f32.xlu1 %v573_v32  ;;  %701 = vmax.xlane.f32.xlu0 %v700_v33  ;;  %vm941_vm4 = vcmask 1043456   ;;  %vm943_vm8 = vcmask 1044480   ;;  %vm945_vm9 = vcmask 1045504   ;;  %vm947_vm10 = vcmask 1046528  }
  0xa4   : > { %v839_v61 = vand.u32 127, %v838_v0  ;;  %v841_v62 = vshrl.u32 %v838_v0, 7  ;;  %vm1189_vm11 = vcmask 31744   ;;  %vm1196_vm12 = vcmask 25600  }
  0xa6   : > { %v1825_v1 = vsub.s32 %v839_v61, %v841_v62 }
  0xa7   : > { %767 = vmax.xlane.f32.xlu1 %v766_v40  ;;  %814 = vmax.xlane.f32.xlu0 %v813_v9 }
  0xab   : > { %458 = vmax.xlane.f32.xlu1 %v457_v22  ;;  %638 = vmax.xlane.f32.xlu0 %v637_v41 }
  0xaf   : > { %704 = vmax.xlane.f32.xlu1 %v703_v42  ;;  %710 = vmax.xlane.f32.xlu0 %v709_v43 }
  0xb3   : > { %818 = vmax.xlane.f32.xlu1 %v817_v44  ;;  %504 = vmax.xlane.f32.xlu0 %v503_v45 }
  0xb7   : > { %641 = vmax.xlane.f32.xlu1 %v640_v30  ;;  %707 = vmax.xlane.f32.xlu0 %v706_v47 }
  0xbb   : > { %754 = vmax.xlane.f32.xlu1 %v753_v48  ;;  %822 = vmax.xlane.f32.xlu0 %v821_v36 }
  0xbf   : > { %509 = vmax.xlane.f32.xlu1 %v508_v49  ;;  %578 = vmax.xlane.f32.xlu0 %v577_v50 }
  0xc3   : > { %644 = vmax.xlane.f32.xlu1 %v643_v51  ;;  %650 = vmax.xlane.f32.xlu0 %v649_v52 }
  0xc7   : > { %826 = vmax.xlane.f32.xlu1 %v825_v37  ;;  %830 = vmax.xlane.f32.xlu0 %v829_v39 }
  0xcb   : > { %834 = vmax.xlane.f32.xlu1 %v833_v38  ;;  %581 = vmax.xlane.f32.xlu0 %v580_v17 }
  0xcf   : > { %647 = vmax.xlane.f32.xlu1 %v646_v6  ;;  %584 = vmax.xlane.f32.xlu0 %v583_v31 }
  0xd3   : > { %758 = vmax.xlane.f32.xlu1 %v757_v46  ;;  %v262_v19 = vpop.xlane.xlu1 %261  ;;  %v258_v53 = vpop.xlane.xlu0 %257 }
  0xd4   : > { %v849_v14 = vrot.slane %v258_v53, %v1825_v1  ;;  %v855_v21 = vrot.slane %v262_v19, %v1825_v1 }
  0xd7   : > { %v297_v55 = vpop.xlane.xlu1 %296  ;;  %v300_v56 = vpop.xlane.xlu0 %299 }
  0xd8   : > { %v861_v24 = vrot.slane %v297_v55, %v1825_v1  ;;  %v867_v16 = vrot.slane %v300_v56, %v1825_v1 }
  0xe5   : > { %v345_v57 = vpop.xlane.xlu1 %344  ;;  %v350_v58 = vpop.xlane.xlu0 %349 }
  0xe6   : > { %v346_v15 = vmax.f32 %v345_v57, 0.0  ;;  %v351_v23 = vmax.f32 %v350_v58, 0.0 }
  0xe8   : > { %v873_v5 = vrot.slane %v346_v15, %v1825_v1  ;;  %v879_v18 = vrot.slane %v351_v23, %v1825_v1 }
  0xe9   : > { %v355_v59 = vpop.xlane.xlu1 %354 }
  0xea   : > { %v1823_v60 = vpop.xlane.xlu0 %399  ;;  %v356_v25 = vmax.f32 %v355_v59, 0.0 }
  0xec   : > { %v885_v31 = vrot.slane %v356_v25, %v1825_v1 }
  0xf5   : > { %v515_v63 = vpop.xlane.xlu1 %514  ;;  %v520_v54 = vpop.xlane.xlu0 %519 }
  0xf6   : > { %v516_v2 = vmax.f32 %v515_v63, 0.0  ;;  %v521_v3 = vmax.f32 %v520_v54, 0.0 }
  0xf8   : > { %v960_v7 = vrot.slane %v516_v2, %v1825_v1  ;;  %v966_v8 = vrot.slane %v521_v3, %v1825_v1 }
  0xfa   : > { %v1052_v10 = vsel %vm935_vm1, %v960_v7, %v966_v8 }
  0xfc   : > { %v591_v12 = vpop.xlane.xlu1 %590 }
  0xfd   : > { %v592_v41 = vmax.f32 %v591_v12, 0.0 }
  0xff   : > { %v1014_v45 = vrot.slane %v592_v41, %v1825_v1 }
 0x100   : > { %v1841_v26 = vpop.xlane.xlu1 %406 }
 0x106   : > { %v695_v11 = vpop.xlane.xlu0 %694 }
 0x107   : > { %v696_v46 = vmax.f32 %v695_v11, 0.0 }
 0x109   : > { %v1070_v56 = vrot.slane %v696_v46, %v1825_v1 }
 0x10d   : > { %v222_v13 = vpop.xlane.xlu0 %221 }
 0x10e   : > { %v843_v20 = vrot.slane %v222_v13, %v1825_v1 }
 0x110   : > { %v936_v4 = vsel %vm935_vm1, %v843_v20, %v849_v14 }
 0x111   : > { %v938_v27 = vsel %vm937_vm2, %v936_v4, %v855_v21  ;;  %v525_v28 = vpop.xlane.xlu0 %524 }
 0x112   : > { %v940_v6 = vsel %vm939_vm3, %v938_v27, %v861_v24  ;;  %v526_v17 = vmax.f32 %v525_v28, 0.0 }
 0x113   : > { %v942_v29 = vsel %vm941_vm4, %v940_v6, %v867_v16 }
 0x114   : > { %v944_v32 = vsel %vm943_vm8, %v942_v29, %v873_v5  ;;  %v972_v33 = vrot.slane %v526_v17, %v1825_v1  ;;  %v401_v17 = vmax.f32 %v1823_v60, 0.0 }
 0x115   : > { %v1856_v34 = vpop.xlane.xlu0 %403  ;;  %v946_v35 = vsel %vm945_vm9, %v944_v32, %v879_v18 }
 0x116   : > { %v1053_v36 = vsel %vm937_vm2, %v1052_v10, %v972_v33  ;;  %v948_v37 = vsel %vm947_vm10, %v946_v35, %v885_v31  ;;  %v635_v38 = vpop.xlane.xlu1 %634  ;;  %v897_v33 = vrot.slane %v1856_v34, %v1825_v1 }
 0x117   : > { %1190 = vst.msk [vmem:[%s1854_s25] sm:$0xff] %vm1189_vm11, %v948_v37  ;;  %v636_v43 = vmax.f32 %v635_v38, 0.0  ;;  %v408_v37 = vmax.f32 %v1841_v26, 0.0 }
 0x119   : > { %v530_v39 = vpop.xlane.xlu0 %529  ;;  %v1020_v48 = vrot.slane %v636_v43, %v1825_v1 }
 0x11a   : > { %v531_v40 = vmax.f32 %v530_v39, 0.0 }
 0x11c   : > { %v978_v9 = vrot.slane %v531_v40, %v1825_v1 }
 0x11d   : > { %v1864_v22 = vpop.xlane.xlu1 %450  ;;  %v699_v47 = vpop.xlane.xlu0 %698 }
 0x11e   : > { %v1054_v42 = vsel %vm939_vm3, %v1053_v36, %v978_v9  ;;  %v1076_v55 = vrot.slane %v699_v47, %v1825_v1  ;;  %v891_v36 = vrot.slane %v401_v17, %v1825_v1  ;;  %v452_v40 = vmax.f32 %v1864_v22, 0.0 }
 0x120   : > { %v1162_v61 = vsel %vm935_vm1, %v1070_v56, %v1076_v55  ;;  %v949_v34 = vsel %vm935_vm1, %v891_v36, %v897_v33 }
 0x121   : > { %v588_v44 = vpop.xlane.xlu1 %587 }
 0x122   : > { %v1008_v30 = vrot.slane %v588_v44, %v1825_v1 }
 0x124   : > { %v1059_v49 = vsel %vm935_vm1, %v1008_v30, %v1014_v45  ;;  %v903_v30 = vrot.slane %v408_v37, %v1825_v1 }
 0x125   : > { %v1060_v50 = vsel %vm937_vm2, %v1059_v49, %v1020_v48 }
 0x128   : > { %v762_v51 = vpop.xlane.xlu1 %761  ;;  %v765_v52 = vpop.xlane.xlu0 %764 }
 0x129   : > { %v1124_v63 = vrot.slane %v765_v52, %v1825_v1  ;;  %v1118_v3 = vrot.slane %v762_v51, %v1825_v1  ;;  %v950_v51 = vsel %vm937_vm2, %v949_v34, %v903_v30 }
 0x12b   : > { %v1169_v14 = vsel %vm935_vm1, %v1118_v3, %v1124_v63 }
 0x12c   : > { %v771_v19 = vpop.xlane.xlu1 %770  ;;  %v455_v53 = vpop.xlane.xlu0 %454 }
 0x12d   : > { %v772_v62 = vmax.f32 %v771_v19, 0.0 }
 0x12f   : > { %v1136_v13 = vrot.slane %v772_v62, %v1825_v1 }
 0x130   : > { %v575_v57 = vpop.xlane.xlu1 %574  ;;  %v702_v58 = vpop.xlane.xlu0 %701 }
 0x131   : > { %v576_v0 = vmax.f32 %v575_v57, 0.0  ;;  %v1082_v59 = vrot.slane %v702_v58, %v1825_v1 }
 0x133   : > { %v984_v54 = vrot.slane %v576_v0, %v1825_v1  ;;  %v1163_v2 = vsel %vm937_vm2, %v1162_v61, %v1082_v59 }
 0x134   : > { %v768_v7 = vpop.xlane.xlu1 %767  ;;  %v815_v8 = vpop.xlane.xlu0 %814 }
 0x135   : > { %v1055_v10 = vsel %vm941_vm4, %v1054_v42, %v984_v54  ;;  %v1130_v11 = vrot.slane %v768_v7, %v1825_v1  ;;  %v816_v12 = vmax.f32 %v815_v8, 0.0  ;;  %v456_v42 = vmax.f32 %v455_v53, 0.0 }
 0x137   : > { %v1170_v15 = vsel %vm937_vm2, %v1169_v14, %v1130_v11  ;;  %v1142_v20 = vrot.slane %v816_v12, %v1825_v1  ;;  %v915_v52 = vrot.slane %v456_v42, %v1825_v1 }
 0x138   : > { %v1171_v21 = vsel %vm939_vm3, %v1170_v15, %v1136_v13  ;;  %v459_v23 = vpop.xlane.xlu1 %458  ;;  %v639_v24 = vpop.xlane.xlu0 %638 }
 0x139   : > { %v1172_v25 = vsel %vm941_vm4, %v1171_v21, %v1142_v20  ;;  %v1026_v4 = vrot.slane %v639_v24, %v1825_v1  ;;  %v460_v44 = vmax.f32 %v459_v23, 0.0 }
 0x13b   : > { %v1061_v16 = vsel %vm939_vm3, %v1060_v50, %v1026_v4  ;;  %v909_v50 = vrot.slane %v452_v40, %v1825_v1  ;;  %v921_v46 = vrot.slane %v460_v44, %v1825_v1 }
 0x13c   : > { %v705_v27 = vpop.xlane.xlu1 %704  ;;  %v711_v28 = vpop.xlane.xlu0 %710 }
 0x13d   : > { %v1088_v5 = vrot.slane %v705_v27, %v1825_v1  ;;  %v712_v32 = vmax.f32 %v711_v28, 0.0  ;;  %v951_v56 = vsel %vm939_vm3, %v950_v51, %v909_v50 }
 0x13e   : > { %v952_v0 = vsel %vm941_vm4, %v951_v56, %v915_v52 }
 0x13f   : > { %v1164_v6 = vsel %vm939_vm3, %v1163_v2, %v1088_v5  ;;  %v1100_v43 = vrot.slane %v712_v32, %v1825_v1  ;;  %v953_v59 = vsel %vm943_vm8, %v952_v0, %v921_v46 }
 0x140   : > { %v819_v18 = vpop.xlane.xlu1 %818  ;;  %v505_v29 = vpop.xlane.xlu0 %504 }
 0x141   : > { %v820_v31 = vmax.f32 %v819_v18, 0.0  ;;  %v506_v47 = vmax.f32 %v505_v29, 0.0 }
 0x143   : > { %v1148_v35 = vrot.slane %v820_v31, %v1825_v1  ;;  %v927_v19 = vrot.slane %v506_v47, %v1825_v1 }
 0x144   : > { %v642_v38 = vpop.xlane.xlu1 %641  ;;  %v708_v39 = vpop.xlane.xlu0 %707 }
 0x145   : > { %v1173_v9 = vsel %vm943_vm8, %v1172_v25, %v1148_v35  ;;  %v1032_v60 = vrot.slane %v642_v38, %v1825_v1  ;;  %v1094_v41 = vrot.slane %v708_v39, %v1825_v1  ;;  %v954_v63 = vsel %vm945_vm9, %v953_v59, %v927_v19 }
 0x147   : > { %v1062_v45 = vsel %vm941_vm4, %v1061_v16, %v1032_v60  ;;  %v1165_v26 = vsel %vm941_vm4, %v1164_v6, %v1094_v41 }
 0x148   : > { %v755_v22 = vpop.xlane.xlu1 %754  ;;  %v1166_v48 = vsel %vm943_vm8, %v1165_v26, %v1100_v43  ;;  %v823_v49 = vpop.xlane.xlu0 %822 }
 0x149   : > { %v824_v54 = vmax.f32 %v823_v49, 0.0  ;;  %v756_v27 = vmax.f32 %v755_v22, 0.0 }
 0x14b   : > { %v1154_v12 = vrot.slane %v824_v54, %v1825_v1  ;;  %v1106_v33 = vrot.slane %v756_v27, %v1825_v1 }
 0x14c   : > { %v510_v53 = vpop.xlane.xlu1 %509  ;;  %v579_v55 = vpop.xlane.xlu0 %578 }
 0x14d   : > { %v511_v57 = vmax.f32 %v510_v53, 0.0  ;;  %v990_v58 = vrot.slane %v579_v55, %v1825_v1  ;;  %v1174_v21 = vsel %vm945_vm9, %v1173_v9, %v1154_v12  ;;  %v1167_v60 = vsel %vm945_vm9, %v1166_v48, %v1106_v33 }
 0x14f   : > { %v933_v61 = vrot.slane %v511_v57, %v1825_v1  ;;  %v1056_v62 = vsel %vm943_vm8, %v1055_v10, %v990_v58 }
 0x150   : > { %v645_v2 = vpop.xlane.xlu1 %644  ;;  %v651_v3 = vpop.xlane.xlu0 %650 }
 0x151   : > { %v955_v7 = vsel %vm947_vm10, %v954_v63, %v933_v61  ;;  %v1038_v8 = vrot.slane %v645_v2, %v1825_v1  ;;  %v652_v28 = vmax.f32 %v651_v3, 0.0 }
 0x152   : > { %1191 = vst.msk [vmem:[%s1854_s25 + $0x8] sm:$0xff] %vm1189_vm11, %v955_v7 }
 0x153   : > { %v1063_v11 = vsel %vm943_vm8, %v1062_v45, %v1038_v8  ;;  %v1050_v35 = vrot.slane %v652_v28, %v1825_v1 }
 0x154   : > { %v827_v13 = vpop.xlane.xlu1 %826  ;;  %v831_v14 = vpop.xlane.xlu0 %830 }
 0x155   : > { %v828_v15 = vmax.f32 %v827_v13, 0.0  ;;  %v832_v10 = vmax.f32 %v831_v14, 0.0 }
 0x157   : > { %v1160_v20 = vrot.slane %v828_v15, %v1825_v1  ;;  %v1180_v16 = vrot.slane %v832_v10, %v1825_v1 }
 0x158   : > { %v835_v23 = vpop.xlane.xlu1 %834  ;;  %v582_v24 = vpop.xlane.xlu0 %581 }
 0x159   : > { %v1175_v25 = vsel %vm947_vm10, %v1174_v21, %v1160_v20  ;;  %v836_v4 = vmax.f32 %v835_v23, 0.0  ;;  %v996_v5 = vrot.slane %v582_v24, %v1825_v1 }
 0x15a   : > { %1195 = vst.msk [vmem:[%s1854_s25 + $0x28] sm:$0xff] %vm1189_vm11, %v1175_v25 }
 0x15b   : > { %v1186_v6 = vrot.slane %v836_v4, %v1825_v1  ;;  %v1057_v36 = vsel %vm945_vm9, %v1056_v62, %v996_v5 }
 0x15c   : > { %v648_v17 = vpop.xlane.xlu1 %647  ;;  %v585_v18 = vpop.xlane.xlu0 %584 }
 0x15d   : > { %v1188_v29 = vsel %vm935_vm1, %v1180_v16, %v1186_v6  ;;  %v1044_v31 = vrot.slane %v648_v17, %v1825_v1  ;;  %v1002_v32 = vrot.slane %v585_v18, %v1825_v1 }
 0x15e   : > { %1197 = vst.msk [vmem:[%s1854_s25 + $0x30] sm:$0x3] %vm1196_vm12, %v1188_v29 }
 0x15f   : > { %v1064_v37 = vsel %vm945_vm9, %v1063_v11, %v1044_v31  ;;  %v1058_v38 = vsel %vm947_vm10, %v1057_v36, %v1002_v32 }
 0x160   : > { %v1065_v39 = vsel %vm947_vm10, %v1064_v37, %v1050_v35  ;;  %v759_v40 = vpop.xlane.xlu1 %758  ;;  %1192 = vst.msk [vmem:[%s1854_s25 + $0x10] sm:$0xff] %vm1189_vm11, %v1058_v38 }
 0x161   : > { %1193 = vst.msk [vmem:[%s1854_s25 + $0x18] sm:$0xff] %vm1189_vm11, %v1065_v39  ;;  %v1112_v9 = vrot.slane %v759_v40, %v1825_v1 }
 0x163   : > { %v1168_v41 = vsel %vm947_vm10, %v1167_v60, %v1112_v9 }
 0x164   : > { %1194 = vst.msk [vmem:[%s1854_s25 + $0x20] sm:$0xff] %vm1189_vm11, %v1168_v41 }
 0x165 PF: > { %s14_s11 = sadd.s32 1, %s1441_s11   ;;  %s1976_s6 = smov %s1425_s7 }
 0x166   : > { %p11_p9 = scmp.ge.s32.totalorder %s14_s11, 4   ;;  %s1977_s7 = smov %s1429_s8 }
 0x167   : > { %s1978_s8 = smov %s1505_s18  ;;  %s1979_s9 = smov %s1437_s10 }
 0x168   : > { %s1980_s10 = smov %s1982_s13  ;;  %13 = sbr.rel (!%p11_p9) target bundleno = 4 (0x4), region = 64 }
 0x16f   :  { %1225 = vsyncpa [#allocation3], 1 }
 0x170   :  { %1227 = vsyncpa [#allocation3 + $0x1], 1 }

</bundles_post_ra>
